<compile_context>
chip_gen: v7x
topology: tpu7x:2x2x1
jax: 0.10.0
libtpu: 0.0.40
codegen_flags: <defaults>
</compile_context>

<pallas_src>
import functools

import jax
import jax.numpy as jnp
from jax.experimental import pallas as pl
from jax.experimental.pallas import tpu as pltpu

_LANES = 128
_SUBLANES = 8
# Scoped-VMEM budget: safe on v5e/v6e (128 MiB physical, 16/32 MiB default
# scope) and on v7x (64 MiB physical).
_VMEM_LIMIT_BYTES = 32 * 1024 * 1024
# Keep the pass-1 working set comfortably below the scoped limit.
_PASS1_VMEM_BUDGET = 12 * 1024 * 1024


def _round_up(x, m):
    return (x + m - 1) // m * m


def _pick_slab_rows(h, w, cin_p, cmid_p):
    """Largest divisor TH of H whose pass-1 working set fits the VMEM budget."""
    img = 2 * (h + 2) * (w + 2) * cin_p * 2          # resident padded image (2 bufs)
    wts = 2 * 9 * cin_p * cmid_p * 2                 # resident folded weights
    best = 1
    for th in range(1, h + 1):
        if h % th:
            continue
        m = th * w
        need = (img + wts
                + 2 * m * cmid_p * 2                 # bf16 out block, double-buffered
                + 2 * 8 * cmid_p * 4                 # stats block
                + m * 9 * cin_p * 2                  # im2col lhs (bf16)
                + m * cmid_p * 4                     # f32 matmul accumulator
                + 2 * (th + 2) * (w + 2) * cin_p * 2)  # slab value + slice scratch
        if need <= _PASS1_VMEM_BUDGET:
            best = th
    # TODO(synk): for images whose padded bf16 copy alone exceeds the budget,
    # switch pass 1 to memory_space=pl.ANY with a manually DMA'd haloed slab.
    return best


def _pick_tile_m(m_rows):
    """Pass-2 M tile: big (512-1024) when possible; cdiv-safe otherwise."""
    for t in (1024, 512, 256, 128, 64, 32, 16, 8):
        if t <= m_rows and m_rows % t == 0:
            return t
    return min(512, _round_up(m_rows, _SUBLANES))


# ---------------------------------------------------------------------------
# Pass 1: 3x3 conv on a TH-row slab (single tap-folded matmul) + BN partials.
# ---------------------------------------------------------------------------
def _conv3x3_stats_kernel(x_ref, w_ref, out_ref, stats_ref, *, th, w_out, cin_p):
    """Block shapes:
      x     : (1, H+2, W+2, Cin_p)   bf16  full padded image (resident / batch)
      w     : (9*Cin_p, Cmid_p)      bf16  tap-folded weights (dy, dx, cin)
      out   : (1, 1, TH*W, Cmid_p)   bf16  conv output slab, rows flattened
      stats : (1, 1, 8, Cmid_p)      f32   rows 0/1 = [sum, sum_sq] of slab
    """
    ri = pl.program_id(1)
    row0 = ri * th
    slab = x_ref[0, pl.ds(row0, th + 2)]             # [TH+2, W+2, Cin_p] bf16

    # im2col in VMEM: nine shifted windows concatenated along channels, then a
    # single MXU matmul with K = 9*Cin_p and M = TH*W (feedback opts 1 + 2).
    taps = [slab[dy:dy + th, dx:dx + w_out, :]
            for dy in range(3) for dx in range(3)]
    lhs = jnp.concatenate(taps, axis=-1)             # [TH, W, 9*Cin_p]
    lhs = lhs.reshape(th * w_out, 9 * cin_p)         # [M, K]
    acc = jnp.dot(lhs, w_ref[...], preferred_element_type=jnp.float32)

    out_ref[0, 0] = acc.astype(out_ref.dtype)        # bf16 writeback (opt 3)

    cmid_p = acc.shape[-1]
    s0 = jnp.sum(acc, axis=0, keepdims=True)         # [1, Cmid_p]
    s1 = jnp.sum(acc * acc, axis=0, keepdims=True)   # [1, Cmid_p]
    rows = jax.lax.broadcasted_iota(jnp.int32, (8, cmid_p), 0)
    stats_ref[0, 0] = jnp.where(rows == 0, s0, jnp.where(rows == 1, s1, 0.0))


# ---------------------------------------------------------------------------
# Pass 2: BatchNorm (precomputed scale/shift) + ReLU + 1x1 conv, fused.
# ---------------------------------------------------------------------------
def _bn_relu_conv1x1_kernel(x_ref, scale_ref, shift_ref, w_ref, o_ref):
    x = x_ref[...].astype(jnp.float32)               # bf16 mid -> f32 for BN
    y = jnp.maximum(x * scale_ref[...] + shift_ref[...], 0.0)
    o_ref[...] = jnp.dot(y.astype(jnp.bfloat16), w_ref[...],
                         preferred_element_type=jnp.float32)


def bisenet_output_nhwc(x_nhwc, w3_oihw, gamma, beta, w1_oihw, *, eps=1e-5):
    """BiSeNetOutput forward. x: [N,H,W,Cin] f32 -> [N,H,W,n_classes] f32."""
    n, h, w, cin = x_nhwc.shape
    cmid = w3_oihw.shape[0]
    ncls = w1_oihw.shape[0]
    assert w3_oihw.shape == (cmid, cin, 3, 3)
    assert w1_oihw.shape == (ncls, cmid, 1, 1)

    cin_p = _round_up(max(cin, _SUBLANES), _SUBLANES)
    cmid_p = _round_up(max(cmid, _LANES), _LANES)    # lane-dense mid activation

    # ---------------- pass-1 operands (bf16 MXU inputs) ----------------------
    xp = jnp.pad(x_nhwc.astype(jnp.float32),
                 ((0, 0), (1, 1), (1, 1), (0, cin_p - cin)))
    xp = xp.astype(jnp.bfloat16)                     # [N, H+2, W+2, Cin_p]

    # [Cmid,Cin,3,3] -> [3,3,Cin,Cmid] -> pad -> [9*Cin_p, Cmid_p] bf16.
    wt = jnp.transpose(w3_oihw.astype(jnp.float32), (2, 3, 1, 0))
    wt = jnp.pad(wt, ((0, 0), (0, 0), (0, cin_p - cin), (0, cmid_p - cmid)))
    wt = wt.reshape(9 * cin_p, cmid_p).astype(jnp.bfloat16)

    th = _pick_slab_rows(h, w, cin_p, cmid_p)
    num_slabs = h // th

    conv_mid, stats = pl.pallas_call(
        functools.partial(_conv3x3_stats_kernel, th=th, w_out=w, cin_p=cin_p),
        grid=(n, num_slabs),
        in_specs=[
            # Same block index across the slab axis -> image DMA'd once/batch.
            pl.BlockSpec((1, h + 2, w + 2, cin_p), lambda bi, ri: (bi, 0, 0, 0)),
            pl.BlockSpec((9 * cin_p, cmid_p), lambda bi, ri: (0, 0)),
        ],
        out_specs=[
            pl.BlockSpec((1, 1, th * w, cmid_p), lambda bi, ri: (bi, ri, 0, 0)),
            pl.BlockSpec((1, 1, 8, cmid_p), lambda bi, ri: (bi, ri, 0, 0)),
        ],
        out_shape=[
            jax.ShapeDtypeStruct((n, num_slabs, th * w, cmid_p), jnp.bfloat16),
            jax.ShapeDtypeStruct((n, num_slabs, 8, cmid_p), jnp.float32),
        ],
        compiler_params=pltpu.CompilerParams(
            dimension_semantics=("parallel", "parallel"),
            vmem_limit_bytes=_VMEM_LIMIT_BYTES),
    )(xp, wt)

    # ---------------- BN statistics -> per-channel scale / shift -------------
    m_count = n * h * w
    gamma_p = jnp.pad(gamma.astype(jnp.float32), (0, cmid_p - cmid))
    beta_p = jnp.pad(beta.astype(jnp.float32), (0, cmid_p - cmid))

    tot = jnp.sum(stats, axis=(0, 1))                       # [8, Cmid_p]
    mean = tot[0] / m_count
    var = jnp.maximum(tot[1] / m_count - mean * mean, 0.0)  # biased (BN train)
    inv = jax.lax.rsqrt(var + eps)
    scale = (gamma_p * inv).reshape(1, cmid_p)
    shift = (beta_p - mean * gamma_p * inv).reshape(1, cmid_p)

    # 1x1 conv weight [Ncls,Cmid,1,1] -> [Cmid_p, Ncls] (K padded, N left narrow
    # so the final store is exactly the useful class width).
    w1 = w1_oihw.reshape(ncls, cmid).astype(jnp.float32).T
    w1 = jnp.pad(w1, ((0, cmid_p - cmid), (0, 0))).astype(jnp.bfloat16)

    # ---------------- pass 2: BN + ReLU + 1x1 conv, M-tiled -------------------
    x2 = conv_mid.reshape(m_count, cmid_p)           # contiguous, free reshape
    tile_m = _pick_tile_m(m_count)
    out_flat = pl.pallas_call(
        _bn_relu_conv1x1_kernel,
        grid=(pl.cdiv(m_count, tile_m),),
        in_specs=[
            pl.BlockSpec((tile_m, cmid_p), lambda i: (i, 0)),
            pl.BlockSpec((1, cmid_p), lambda i: (0, 0)),
            pl.BlockSpec((1, cmid_p), lambda i: (0, 0)),
            pl.BlockSpec((cmid_p, ncls), lambda i: (0, 0)),
        ],
        out_specs=pl.BlockSpec((tile_m, ncls), lambda i: (i, 0)),
        out_shape=jax.ShapeDtypeStruct((m_count, ncls), jnp.float32),
        compiler_params=pltpu.CompilerParams(
            dimension_semantics=("parallel",),
            vmem_limit_bytes=_VMEM_LIMIT_BYTES),
    )(x2, scale, shift, w1)

    return out_flat.reshape(n, h, w, ncls)


def bisenet_output_nchw(x_nchw, w3_oihw, gamma, beta, w1_oihw, *, eps=1e-5):
    """NCHW adapter for PyTorch layout parity (NHWC entry point is the fast path)."""
    x_nhwc = jnp.transpose(x_nchw, (0, 2, 3, 1))
    out_nhwc = bisenet_output_nhwc(x_nhwc, w3_oihw, gamma, beta, w1_oihw, eps=eps)
    return jnp.transpose(out_nhwc, (0, 3, 1, 2))


def _reference_nchw(x, w3, gamma, beta, w1, *, eps=1e-5):
    """Pure-JAX f32 reference of the PyTorch forward (training-mode BN)."""
    y = jax.lax.conv_general_dilated(
        x, w3, window_strides=(1, 1), padding=((1, 1), (1, 1)),
        dimension_numbers=("NCHW", "OIHW", "NCHW"))
    mean = jnp.mean(y, axis=(0, 2, 3), keepdims=True)
    var = jnp.var(y, axis=(0, 2, 3), keepdims=True)
    y = (y - mean) * jax.lax.rsqrt(var + eps)
    y = y * gamma[None, :, None, None] + beta[None, :, None, None]
    y = jnp.maximum(y, 0.0)
    return jax.lax.conv_general_dilated(
        y, w1, window_strides=(1, 1), padding="VALID",
        dimension_numbers=("NCHW", "OIHW", "NCHW"))


if __name__ == "__main__":
    key = jax.random.PRNGKey(0)
    k_x, k_w3, k_w1 = jax.random.split(key, 3)

    # BiSeNetOutput(4, 32, 8) on a [2, 4, 16, 16] input.
    N, CIN, H, W = 2, 4, 16, 16
    CMID, NCLS = 32, 8

    x = jax.random.normal(k_x, (N, CIN, H, W), dtype=jnp.float32)

    # init_weight(): kaiming_normal_(a=1) -> std = sqrt(2/(1+1)/fan_in) = sqrt(1/fan_in)
    w3_std = (1.0 / (CIN * 3 * 3)) ** 0.5
    w3 = w3_std * jax.random.normal(k_w3, (CMID, CIN, 3, 3), dtype=jnp.float32)
    w1_std = (1.0 / CMID) ** 0.5
    w1 = w1_std * jax.random.normal(k_w1, (NCLS, CMID, 1, 1), dtype=jnp.float32)

    # BatchNorm2d default affine params.
    gamma = jnp.ones((CMID,), dtype=jnp.float32)
    beta = jnp.zeros((CMID,), dtype=jnp.float32)

    out = jax.jit(bisenet_output_nchw)(x, w3, gamma, beta, w1)
    jax.block_until_ready(out)

    assert out.shape == (N, NCLS, H, W), out.shape
    assert bool(jnp.all(jnp.isfinite(out))), "non-finite output"

    # Tolerance-asserted pure-JAX f32 reference (kernel runs bf16 on the MXU).
    ref = _reference_nchw(x, w3, gamma, beta, w1)
    rel_l2 = jnp.linalg.norm(out - ref) / (jnp.linalg.norm(ref) + 1e-12)
    assert float(rel_l2) < 0.05, f"relative L2 error too high: {float(rel_l2)}"

    print("KERNEL_OK")
</pallas_src>

<mosaic_0001>
module attributes {stable_mosaic.version = 11 : i64} {
  func.func @_conv3x3_stats_kernel(%arg0: i32, %arg1: i32, %arg2: memref<1x18x18x8xbf16, #tpu.memory_space<vmem>>, %arg3: memref<72x128xbf16, #tpu.memory_space<vmem>>, %arg4: memref<1x1x256x128xbf16, #tpu.memory_space<vmem>>, %arg5: memref<1x1x8x128xf32, #tpu.memory_space<vmem>>) attributes {dimension_semantics = [#tpu.dimension_semantics<parallel>, #tpu.dimension_semantics<parallel>], iteration_bounds = array<i64: 2, 1>, scalar_prefetch = 0 : i64, scratch_operands = 0 : i64, tpu.core_type = #tpu.core_type<tc>, window_params = [{transform_indices = @transform_0, window_bounds = array<i64: 1, 18, 18, 8>}, {pipeline_mode = #tpu.pipeline_mode<synchronous>, transform_indices = @transform_1, window_bounds = array<i64: 72, 128>}, {transform_indices = @transform_2, window_bounds = array<i64: 1, 1, 256, 128>}, {transform_indices = @transform_3, window_bounds = array<i64: 1, 1, 8, 128>}]} {
    %c16_i32 = arith.constant 16 : i32
    %0 = arith.muli %arg1, %c16_i32 : i32
    %c0 = arith.constant 0 : index
    %1 = arith.index_cast %0 : i32 to index
    %c0_0 = arith.constant 0 : index
    %c0_1 = arith.constant 0 : index
    %2 = vector.load %arg2[%c0, %1, %c0_0, %c0_1] : memref<1x18x18x8xbf16, #tpu.memory_space<vmem>>, vector<1x18x18x8xbf16>
    %3 = vector.shape_cast %2 : vector<1x18x18x8xbf16> to vector<18x18x8xbf16>
    %4 = vector.extract_strided_slice %3 {offsets = [0, 0, 0], sizes = [16, 16, 8], strides = [1, 1, 1]} : vector<18x18x8xbf16> to vector<16x16x8xbf16>
    %5 = vector.extract_strided_slice %3 {offsets = [0, 1, 0], sizes = [16, 16, 8], strides = [1, 1, 1]} : vector<18x18x8xbf16> to vector<16x16x8xbf16>
    %6 = vector.extract_strided_slice %3 {offsets = [0, 2, 0], sizes = [16, 16, 8], strides = [1, 1, 1]} : vector<18x18x8xbf16> to vector<16x16x8xbf16>
    %7 = vector.extract_strided_slice %3 {offsets = [1, 0, 0], sizes = [16, 16, 8], strides = [1, 1, 1]} : vector<18x18x8xbf16> to vector<16x16x8xbf16>
    %8 = vector.extract_strided_slice %3 {offsets = [1, 1, 0], sizes = [16, 16, 8], strides = [1, 1, 1]} : vector<18x18x8xbf16> to vector<16x16x8xbf16>
    %9 = vector.extract_strided_slice %3 {offsets = [1, 2, 0], sizes = [16, 16, 8], strides = [1, 1, 1]} : vector<18x18x8xbf16> to vector<16x16x8xbf16>
    %10 = vector.extract_strided_slice %3 {offsets = [2, 0, 0], sizes = [16, 16, 8], strides = [1, 1, 1]} : vector<18x18x8xbf16> to vector<16x16x8xbf16>
    %11 = vector.extract_strided_slice %3 {offsets = [2, 1, 0], sizes = [16, 16, 8], strides = [1, 1, 1]} : vector<18x18x8xbf16> to vector<16x16x8xbf16>
    %12 = vector.extract_strided_slice %3 {offsets = [2, 2, 0], sizes = [16, 16, 8], strides = [1, 1, 1]} : vector<18x18x8xbf16> to vector<16x16x8xbf16>
    %13 = tpu.concatenate %4, %5, %6, %7, %8, %9, %10, %11, %12 in 2 : vector<16x16x8xbf16>, vector<16x16x8xbf16>, vector<16x16x8xbf16>, vector<16x16x8xbf16>, vector<16x16x8xbf16>, vector<16x16x8xbf16>, vector<16x16x8xbf16>, vector<16x16x8xbf16>, vector<16x16x8xbf16> -> vector<16x16x72xbf16>
    %14 = vector.shape_cast %13 : vector<16x16x72xbf16> to vector<256x72xbf16>
    %c0_2 = arith.constant 0 : index
    %c0_3 = arith.constant 0 : index
    %15 = vector.load %arg3[%c0_2, %c0_3] : memref<72x128xbf16, #tpu.memory_space<vmem>>, vector<72x128xbf16>
    %cst = arith.constant dense<0.000000e+00> : vector<256x128xf32>
    %16 = tpu.matmul %14, %15, %cst {dimension_numbers = #tpu.dot_dimension_numbers<[1], [0], [0], [1], [0, 0, 1, 1], [], []>} : vector<256x72xbf16>, vector<72x128xbf16>, vector<256x128xf32> -> vector<256x128xf32>
    %17 = arith.truncf %16 : vector<256x128xf32> to vector<256x128xbf16>
    %c0_4 = arith.constant 0 : index
    %c0_5 = arith.constant 0 : index
    %c0_6 = arith.constant 0 : index
    %c0_7 = arith.constant 0 : index
    %18 = vector.load %arg4[%c0_4, %c0_5, %c0_6, %c0_7] : memref<1x1x256x128xbf16, #tpu.memory_space<vmem>>, vector<1x1x256x128xbf16>
    %19 = vector.shape_cast %18 : vector<1x1x256x128xbf16> to vector<256x128xbf16>
    %20 = vector.shape_cast %17 : vector<256x128xbf16> to vector<1x1x256x128xbf16>
    tpu.vector_store %arg4[%c0_4, %c0_5, %c0_6, %c0_7], %20 {strides = array<i32>} : memref<1x1x256x128xbf16, #tpu.memory_space<vmem>>, vector<1x1x256x128xbf16>,
    %cst_8 = arith.constant dense<0.000000e+00> : vector<128xf32>
    %21 = vector.multi_reduction <add>, %16, %cst_8 [0] : vector<256x128xf32> to vector<128xf32>
    %22 = vector.shape_cast %21 : vector<128xf32> to vector<1x128xf32>
    %23 = arith.mulf %16, %16 : vector<256x128xf32>
    %cst_9 = arith.constant dense<0.000000e+00> : vector<128xf32>
    %24 = vector.multi_reduction <add>, %23, %cst_9 [0] : vector<256x128xf32> to vector<128xf32>
    %25 = vector.shape_cast %24 : vector<128xf32> to vector<1x128xf32>
    %26 = tpu.iota {dimensions = array<i32: 0>} : vector<8x128xi32>
    %c0_i32 = arith.constant 0 : i32
    %27 = vector.broadcast %c0_i32 : i32 to vector<8x128xi32>
    %28 = arith.cmpi eq, %26, %27 : vector<8x128xi32>
    %c1_i32 = arith.constant 1 : i32
    %29 = vector.broadcast %c1_i32 : i32 to vector<8x128xi32>
    %30 = arith.cmpi eq, %26, %29 : vector<8x128xi32>
    %cst_10 = arith.constant 0.000000e+00 : f32
    %31 = vector.shape_cast %25 : vector<1x128xf32> to vector<1x128xf32>
    %32 = vector.broadcast %31 : vector<1x128xf32> to vector<8x128xf32>
    %33 = vector.broadcast %cst_10 : f32 to vector<8x128xf32>
    %34 = arith.select %30, %32, %33 : vector<8x128xi1>, vector<8x128xf32>
    %35 = vector.shape_cast %22 : vector<1x128xf32> to vector<1x128xf32>
    %36 = vector.broadcast %35 : vector<1x128xf32> to vector<8x128xf32>
    %37 = arith.select %28, %36, %34 : vector<8x128xi1>, vector<8x128xf32>
    %c0_11 = arith.constant 0 : index
    %c0_12 = arith.constant 0 : index
    %c0_13 = arith.constant 0 : index
    %c0_14 = arith.constant 0 : index
    %38 = vector.load %arg5[%c0_11, %c0_12, %c0_13, %c0_14] : memref<1x1x8x128xf32, #tpu.memory_space<vmem>>, vector<1x1x8x128xf32>
    %39 = vector.shape_cast %38 : vector<1x1x8x128xf32> to vector<8x128xf32>
    %40 = vector.shape_cast %37 : vector<8x128xf32> to vector<1x1x8x128xf32>
    tpu.vector_store %arg5[%c0_11, %c0_12, %c0_13, %c0_14], %40 {strides = array<i32>} : memref<1x1x8x128xf32, #tpu.memory_space<vmem>>, vector<1x1x8x128xf32>,
    return
  }
  func.func @transform_0(%arg0: i32, %arg1: i32) -> (i32, i32, i32, i32) {
    %c0_i32 = arith.constant 0 : i32
    %c0_i32_0 = arith.constant 0 : i32
    %c0_i32_1 = arith.constant 0 : i32
    %c0_i32_2 = arith.constant 0 : i32
    return %arg0, %c0_i32, %c0_i32_0, %c0_i32_1 : i32, i32, i32, i32
  }
  func.func @transform_1(%arg0: i32, %arg1: i32) -> (i32, i32) {
    %c0_i32 = arith.constant 0 : i32
    %c0_i32_0 = arith.constant 0 : i32
    %c0_i32_1 = arith.constant 0 : i32
    return %c0_i32, %c0_i32_0 : i32, i32
  }
  func.func @transform_2(%arg0: i32, %arg1: i32) -> (i32, i32, i32, i32) {
    %c0_i32 = arith.constant 0 : i32
    %c0_i32_0 = arith.constant 0 : i32
    %c0_i32_1 = arith.constant 0 : i32
    return %arg0, %arg1, %c0_i32, %c0_i32_0 : i32, i32, i32, i32
  }
  func.func @transform_3(%arg0: i32, %arg1: i32) -> (i32, i32, i32, i32) {
    %c0_i32 = arith.constant 0 : i32
    %c0_i32_0 = arith.constant 0 : i32
    %c0_i32_1 = arith.constant 0 : i32
    return %arg0, %arg1, %c0_i32, %c0_i32_0 : i32, i32, i32, i32
  }
}

module attributes {stable_mosaic.version = 11 : i64} {
  func.func @_bn_relu_conv1x1_kernel(%arg0: i32, %arg1: memref<512x128xbf16, #tpu.memory_space<vmem>>, %arg2: memref<1x128xf32, #tpu.memory_space<vmem>>, %arg3: memref<1x128xf32, #tpu.memory_space<vmem>>, %arg4: memref<128x8xbf16, #tpu.memory_space<vmem>>, %arg5: memref<512x8xf32, #tpu.memory_space<vmem>>) attributes {dimension_semantics = [#tpu.dimension_semantics<parallel>], iteration_bounds = array<i64: 1>, scalar_prefetch = 0 : i64, scratch_operands = 0 : i64, tpu.core_type = #tpu.core_type<tc>, window_params = [{transform_indices = @transform_0, window_bounds = array<i64: 512, 128>}, {pipeline_mode = #tpu.pipeline_mode<synchronous>, transform_indices = @transform_1, window_bounds = array<i64: 1, 128>}, {pipeline_mode = #tpu.pipeline_mode<synchronous>, transform_indices = @transform_2, window_bounds = array<i64: 1, 128>}, {pipeline_mode = #tpu.pipeline_mode<synchronous>, transform_indices = @transform_3, window_bounds = array<i64: 128, 8>}, {transform_indices = @transform_4, window_bounds = array<i64: 512, 8>}]} {
    %c0 = arith.constant 0 : index
    %c0_0 = arith.constant 0 : index
    %0 = vector.load %arg1[%c0, %c0_0] : memref<512x128xbf16, #tpu.memory_space<vmem>>, vector<512x128xbf16>
    %1 = arith.extf %0 : vector<512x128xbf16> to vector<512x128xf32>
    %c0_1 = arith.constant 0 : index
    %c0_2 = arith.constant 0 : index
    %2 = vector.load %arg2[%c0_1, %c0_2] : memref<1x128xf32, #tpu.memory_space<vmem>>, vector<1x128xf32>
    %3 = vector.broadcast %2 : vector<1x128xf32> to vector<512x128xf32>
    %4 = arith.mulf %1, %3 : vector<512x128xf32>
    %c0_3 = arith.constant 0 : index
    %c0_4 = arith.constant 0 : index
    %5 = vector.load %arg3[%c0_3, %c0_4] : memref<1x128xf32, #tpu.memory_space<vmem>>, vector<1x128xf32>
    %6 = vector.broadcast %5 : vector<1x128xf32> to vector<512x128xf32>
    %7 = arith.addf %4, %6 : vector<512x128xf32>
    %cst = arith.constant 0.000000e+00 : f32
    %8 = vector.broadcast %cst : f32 to vector<512x128xf32>
    %9 = arith.maximumf %7, %8 : vector<512x128xf32>
    %10 = arith.truncf %9 : vector<512x128xf32> to vector<512x128xbf16>
    %c0_5 = arith.constant 0 : index
    %c0_6 = arith.constant 0 : index
    %11 = vector.load %arg4[%c0_5, %c0_6] : memref<128x8xbf16, #tpu.memory_space<vmem>>, vector<128x8xbf16>
    %cst_7 = arith.constant dense<0.000000e+00> : vector<512x8xf32>
    %12 = tpu.matmul %10, %11, %cst_7 {dimension_numbers = #tpu.dot_dimension_numbers<[1], [0], [0], [1], [0, 0, 1, 1], [], []>} : vector<512x128xbf16>, vector<128x8xbf16>, vector<512x8xf32> -> vector<512x8xf32>
    %c0_8 = arith.constant 0 : index
    %c0_9 = arith.constant 0 : index
    %13 = vector.load %arg5[%c0_8, %c0_9] : memref<512x8xf32, #tpu.memory_space<vmem>>, vector<512x8xf32>
    tpu.vector_store %arg5[%c0_8, %c0_9], %12 {strides = array<i32>} : memref<512x8xf32, #tpu.memory_space<vmem>>, vector<512x8xf32>,
    return
  }
  func.func @transform_0(%arg0: i32) -> (i32, i32) {
    %c0_i32 = arith.constant 0 : i32
    %c0_i32_0 = arith.constant 0 : i32
    return %arg0, %c0_i32 : i32, i32
  }
  func.func @transform_1(%arg0: i32) -> (i32, i32) {
    %c0_i32 = arith.constant 0 : i32
    %c0_i32_0 = arith.constant 0 : i32
    %c0_i32_1 = arith.constant 0 : i32
    return %c0_i32, %c0_i32_0 : i32, i32
  }
  func.func @transform_2(%arg0: i32) -> (i32, i32) {
    %c0_i32 = arith.constant 0 : i32
    %c0_i32_0 = arith.constant 0 : i32
    %c0_i32_1 = arith.constant 0 : i32
    return %c0_i32, %c0_i32_0 : i32, i32
  }
  func.func @transform_3(%arg0: i32) -> (i32, i32) {
    %c0_i32 = arith.constant 0 : i32
    %c0_i32_0 = arith.constant 0 : i32
    %c0_i32_1 = arith.constant 0 : i32
    return %c0_i32, %c0_i32_0 : i32, i32
  }
  func.func @transform_4(%arg0: i32) -> (i32, i32) {
    %c0_i32 = arith.constant 0 : i32
    %c0_i32_0 = arith.constant 0 : i32
    return %arg0, %c0_i32 : i32, i32
  }
}

</mosaic_0001>

<bundles_post_ra>
// kernel: bisenet_output_nchw.3
= control target key start
LH: loop header
LB: loop body
LE: loop exit
PB: predicated region body
PF: predicated region fallthrough
CT: control target
= control target key end

     0   :  { %vm737_vm0 = vcmask 64512   ;;  %s1667_s3 = inlined_call_operand.vmem [shape: bf16[128,8], index: 3, kind: input, shape index: {}]   ;;  %s1668_s0 = inlined_call_operand.vmem [shape: bf16[512,128], index: 0, kind: input, shape index: {}]   ;;  %s1669_s1 = inlined_call_operand.vmem [shape: f32[1,128], index: 1, kind: input, shape index: {}]   ;;  %s1670_s2 = inlined_call_operand.vmem [shape: f32[1,128], index: 2, kind: input, shape index: {}]   ;;  %s1671_s4 = inlined_call_operand.vmem [shape: f32[512,8], index: 4, kind: output, shape index: {}]  }
   0x1   :  { %v1111_v0 = vld [vmem:[%s1667_s3] sm:$0xff]   ;;  %v1112_v1 = vld [vmem:[%s1667_s3 + $0x8] sm:$0xff]   ;;  %v1113_v2 = vld [vmem:[%s1667_s3 + $0x10] sm:$0xff]  }
   0x2   :  { %1015 = vmatprep.subr.bf16.mxu0 %v1111_v0  ;;  %1095 = vmatprep.subr.bf16.mxu1 %v1111_v0  ;;  %v1114_v3 = vld [vmem:[%s1667_s3 + $0x18] sm:$0xff]   ;;  %v817_v4 = vld [vmem:[%s1668_s0] sm:$0xff]   ;;  %v944_v9 = vld [vmem:[%s1668_s0 + $0x8] sm:$0xff]  }
   0x3   :  { %1016 = vmatpush3.bf16.msra.mxu0 %v1111_v0  ;;  %1103 = vmatpush3.bf16.msra.mxu1 %v1111_v0  ;;  %v1162_v5 = vld [vmem:[%s1669_s1] ss:$0 sm:$0xff]  ;;  %v818_v6 = vunpack.c.l.bf16 %v817_v4  ;;  %v819_v7 = vunpack.c.h.bf16 %v817_v4  ;;  %v960_v10 = vld [vmem:[%s1668_s0 + $0x88] sm:$0xff]   ;;  %v822_v14 = vunpack.c.l.bf16 %v944_v9  ;;  %v823_v15 = vunpack.c.h.bf16 %v944_v9  ;;  %v945_v16 = vld [vmem:[%s1668_s0 + $0x10] sm:$0xff]  }
   0x4   :  { %1017 = vmatprep.subr.bf16.mxu0 %v1112_v1  ;;  %1096 = vmatprep.subr.bf16.mxu1 %v1112_v1  ;;  %v959_v8 = vld [vmem:[%s1668_s0 + $0x80] sm:$0xff]   ;;  %v886_v19 = vunpack.c.l.bf16 %v960_v10  ;;  %v887_v20 = vunpack.c.h.bf16 %v960_v10  ;;  %v826_v25 = vunpack.c.l.bf16 %v945_v16  ;;  %v961_v38 = vld [vmem:[%s1668_s0 + $0x90] sm:$0xff]   ;;  %v1116_v39 = vld [vmem:[%s1667_s3 + $0x28] sm:$0xff]   ;;  %v827_v48 = vunpack.c.h.bf16 %v945_v16 }
   0x5   :  { %v1176_v11 = vld [vmem:[%s1670_s2] ss:$0 sm:$0xff]  ;;  %v882_v12 = vunpack.c.l.bf16 %v959_v8  ;;  %v883_v13 = vunpack.c.h.bf16 %v959_v8  ;;  %v153_v17 = vmul.f32 %v818_v6, %v1162_v5  ;;  %v154_v18 = vmul.f32 %v819_v7, %v1162_v5  ;;  %v946_v44 = vld [vmem:[%s1668_s0 + $0x18] sm:$0xff]   ;;  %v1117_v58 = vld [vmem:[%s1667_s3 + $0x30] sm:$0xff]  }
   0x6   :  { %v1115_v21 = vld [vmem:[%s1667_s3 + $0x20] sm:$0xff]   ;;  %v155_v24 = vmul.f32 %v822_v14, %v1162_v5  ;;  %v156_v28 = vmul.f32 %v823_v15, %v1162_v5  ;;  %v187_v29 = vmul.f32 %v886_v19, %v1162_v5  ;;  %v188_v33 = vmul.f32 %v887_v20, %v1162_v5  ;;  %v962_v53 = vld [vmem:[%s1668_s0 + $0x98] sm:$0xff]  }
   0x7   :  { %1018 = vmatpush3.bf16.msra.mxu0 %v1112_v1  ;;  %1104 = vmatpush3.bf16.msra.mxu1 %v1112_v1  ;;  %v185_v22 = vmul.f32 %v882_v12, %v1162_v5  ;;  %v186_v23 = vmul.f32 %v883_v13, %v1162_v5  ;;  %v224_v26 = vadd.f32 %v1176_v11, %v153_v17  ;;  %v890_v52 = vunpack.c.l.bf16 %v961_v38  ;;  %v1118_v14 = vld [vmem:[%s1667_s3 + $0x38] sm:$0xff]   ;;  %v963_v19 = vld [vmem:[%s1668_s0 + $0xa0] sm:$0xff]  }
   0x8   :  { %1019 = vmatprep.subr.bf16.mxu0 %v1113_v2  ;;  %1097 = vmatprep.subr.bf16.mxu1 %v1113_v2  ;;  %v225_v27 = vadd.f32 %v1176_v11, %v154_v18  ;;  %v226_v32 = vadd.f32 %v1176_v11, %v155_v24  ;;  %v227_v36 = vadd.f32 %v1176_v11, %v156_v28  ;;  %v891_v56 = vunpack.c.h.bf16 %v961_v38  ;;  %v948_v28 = vld [vmem:[%s1668_s0 + $0x28] sm:$0xff]  }
   0x9   :  { %v256_v30 = vadd.f32 %v1176_v11, %v185_v22  ;;  %v257_v31 = vadd.f32 %v1176_v11, %v186_v23  ;;  %v288_v34 = vmax.f32 %v224_v26, 0.0  ;;  %v258_v37 = vadd.f32 %v1176_v11, %v187_v29 }
   0xa   :  { %v289_v35 = vmax.f32 %v225_v27, 0.0  ;;  %v290_v42 = vmax.f32 %v226_v32, 0.0  ;;  %v259_v43 = vadd.f32 %v1176_v11, %v188_v33  ;;  %v291_v46 = vmax.f32 %v227_v36, 0.0  ;;  %v964_v33 = vld [vmem:[%s1668_s0 + $0xa8] sm:$0xff]  }
   0xb   :  { %1020 = vmatpush3.bf16.msra.mxu0 %v1113_v2  ;;  %1105 = vmatpush3.bf16.msra.mxu1 %v1113_v2  ;;  %v320_v40 = vmax.f32 %v256_v30, 0.0  ;;  %v321_v41 = vmax.f32 %v257_v31, 0.0  ;;  %v322_v47 = vmax.f32 %v258_v37, 0.0  ;;  %v157_v51 = vmul.f32 %v826_v25, %v1162_v5 }
   0xc   :  { %1021 = vmatprep.subr.bf16.mxu0 %v1114_v3  ;;  %1098 = vmatprep.subr.bf16.mxu1 %v1114_v3  ;;  %v352_v45 = vpack.c.bf16 %v289_v35, %v288_v34  ;;  %v323_v50 = vmax.f32 %v259_v43, 0.0  ;;  %v1213_v54 = vpack.c.bf16 %v291_v46, %v290_v42  ;;  %v158_v55 = vmul.f32 %v827_v48, %v1162_v5  ;;  %v949_v42 = vld [vmem:[%s1668_s0 + $0x30] sm:$0xff]  }
   0xd   :  { %v368_v49 = vpack.c.bf16 %v321_v41, %v320_v40  ;;  %v830_v57 = vunpack.c.l.bf16 %v946_v44  ;;  %v228_v60 = vadd.f32 %v1176_v11, %v157_v51  ;;  %v189_v61 = vmul.f32 %v890_v52, %v1162_v5 }
   0xe   :  { %v1219_v59 = vpack.c.bf16 %v323_v50, %v322_v47  ;;  %v831_v62 = vunpack.c.h.bf16 %v946_v44  ;;  %1031 = vmatprep.mubr.bf16.mxu0 %v352_v45  ;;  %v229_v63 = vadd.f32 %v1176_v11, %v158_v55  ;;  %v190_v0 = vmul.f32 %v891_v56, %v1162_v5 }
   0xf   :  { %1022 = vmatpush3.bf16.msra.mxu0 %v1114_v3  ;;  %1106 = vmatpush3.bf16.msra.mxu1 %v1114_v3  ;;  %v159_v1 = vmul.f32 %v830_v57, %v1162_v5  ;;  %v894_v2 = vunpack.c.l.bf16 %v962_v53  ;;  %v947_v3 = vld [vmem:[%s1668_s0 + $0x20] sm:$0xff]   ;;  %v292_v4 = vmax.f32 %v228_v60, 0.0  ;;  %v260_v6 = vadd.f32 %v1176_v11, %v189_v61  ;;  %v965_v61 = vld [vmem:[%s1668_s0 + $0xb0] sm:$0xff]  }
  0x10   :  { %1023 = vmatprep.subr.bf16.mxu0 %v1115_v21  ;;  %1099 = vmatprep.subr.bf16.mxu1 %v1115_v21  ;;  %v160_v7 = vmul.f32 %v831_v62, %v1162_v5  ;;  %v895_v8 = vunpack.c.h.bf16 %v962_v53  ;;  %v293_v9 = vmax.f32 %v229_v63, 0.0  ;;  %v261_v10 = vadd.f32 %v1176_v11, %v190_v0 }
  0x11   :  { %1063 = vmatprep.mubr.bf16.mxu1 %v368_v49  ;;  %v230_v12 = vadd.f32 %v1176_v11, %v159_v1  ;;  %v191_v13 = vmul.f32 %v894_v2, %v1162_v5  ;;  %v324_v15 = vmax.f32 %v260_v6, 0.0  ;;  %v834_v18 = vunpack.c.l.bf16 %v947_v3  ;;  %v950_v2 = vld [vmem:[%s1668_s0 + $0x38] sm:$0xff]  }
  0x12   :  { %v231_v16 = vadd.f32 %v1176_v11, %v160_v7  ;;  %v192_v17 = vmul.f32 %v895_v8, %v1162_v5  ;;  %v354_v20 = vpack.c.bf16 %v293_v9, %v292_v4  ;;  %v835_v26 = vunpack.c.h.bf16 %v947_v3 }
  0x13   :  { %1024 = vmatpush3.bf16.msra.mxu0 %v1115_v21  ;;  %1107 = vmatpush3.bf16.msra.mxu1 %v1115_v21  ;;  %v325_v21 = vmax.f32 %v261_v10, 0.0  ;;  %v294_v22 = vmax.f32 %v230_v12, 0.0  ;;  %v262_v23 = vadd.f32 %v1176_v11, %v191_v13  ;;  %v161_v27 = vmul.f32 %v834_v18, %v1162_v5 }
  0x14   :  { %1025 = vmatprep.subr.bf16.mxu0 %v1116_v39  ;;  %1100 = vmatprep.subr.bf16.mxu1 %v1116_v39  ;;  %v295_v24 = vmax.f32 %v231_v16, 0.0  ;;  %v263_v25 = vadd.f32 %v1176_v11, %v192_v17  ;;  %v898_v31 = vunpack.c.l.bf16 %v963_v19  ;;  %v899_v32 = vunpack.c.h.bf16 %v963_v19 }
  0x15   :  { %v370_v29 = vpack.c.bf16 %v325_v21, %v324_v15  ;;  %v326_v30 = vmax.f32 %v262_v23, 0.0  ;;  %v162_v36 = vmul.f32 %v835_v26, %v1162_v5  ;;  %v232_v37 = vadd.f32 %v1176_v11, %v161_v27  ;;  %v966_v15 = vld [vmem:[%s1668_s0 + $0xb8] sm:$0xff]  }
  0x16   :  { %v1251_v34 = vpack.c.bf16 %v295_v24, %v294_v22  ;;  %v327_v35 = vmax.f32 %v263_v25, 0.0  ;;  %v193_v38 = vmul.f32 %v898_v31, %v1162_v5  ;;  %v838_v40 = vunpack.c.l.bf16 %v948_v28 }
  0x17   :  { %1026 = vmatpush3.bf16.msra.mxu0 %v1116_v39  ;;  %1108 = vmatpush3.bf16.msra.mxu1 %v1116_v39  ;;  %v194_v39 = vmul.f32 %v899_v32, %v1162_v5  ;;  %v839_v41 = vunpack.c.h.bf16 %v948_v28  ;;  %v233_v44 = vadd.f32 %v1176_v11, %v162_v36  ;;  %v296_v45 = vmax.f32 %v232_v37, 0.0 }
  0x18   :  { %1027 = vmatprep.subr.bf16.mxu0 %v1117_v58  ;;  %1101 = vmatprep.subr.bf16.mxu1 %v1117_v58  ;;  %v371_v43 = vpack.c.bf16 %v327_v35, %v326_v30  ;;  %v902_v46 = vunpack.c.l.bf16 %v964_v33  ;;  %v264_v47 = vadd.f32 %v1176_v11, %v193_v38  ;;  %v163_v49 = vmul.f32 %v838_v40, %v1162_v5 }
  0x19   :  { %v265_v48 = vadd.f32 %v1176_v11, %v194_v39  ;;  %v903_v50 = vunpack.c.h.bf16 %v964_v33  ;;  %v297_v51 = vmax.f32 %v233_v44, 0.0  ;;  %v164_v52 = vmul.f32 %v839_v41, %v1162_v5  ;;  %v967_v33 = vld [vmem:[%s1668_s0 + $0xc0] sm:$0xff]  }
  0x1a   :  { %v195_v53 = vmul.f32 %v902_v46, %v1162_v5  ;;  %v842_v55 = vunpack.c.l.bf16 %v949_v42  ;;  %v328_v56 = vmax.f32 %v264_v47, 0.0  ;;  %v843_v1 = vunpack.c.h.bf16 %v949_v42 }
  0x1b   :  { %1028 = vmatpush3.bf16.msra.mxu0 %v1117_v58  ;;  %1109 = vmatpush3.bf16.msra.mxu1 %v1117_v58  ;;  %v329_v57 = vmax.f32 %v265_v48, 0.0  ;;  %v234_v58 = vadd.f32 %v1176_v11, %v163_v49  ;;  %v196_v60 = vmul.f32 %v903_v50, %v1162_v5  ;;  %v356_v62 = vpack.c.bf16 %v297_v51, %v296_v45  ;;  %v968_v51 = vld [vmem:[%s1668_s0 + $0xc8] sm:$0xff]  }
  0x1c   :  { %1029 = vmatprep.subr.bf16.mxu0 %v1118_v14  ;;  %1102 = vmatprep.subr.bf16.mxu1 %v1118_v14  ;;  %v235_v63 = vadd.f32 %v1176_v11, %v164_v52  ;;  %v266_v0 = vadd.f32 %v1176_v11, %v195_v53  ;;  %v166_v8 = vmul.f32 %v843_v1, %v1162_v5  ;;  %v906_v9 = vunpack.c.l.bf16 %v965_v61 }
  0x1d   :  { %v372_v3 = vpack.c.bf16 %v329_v57, %v328_v56  ;;  %v298_v4 = vmax.f32 %v234_v58, 0.0  ;;  %v267_v6 = vadd.f32 %v1176_v11, %v196_v60  ;;  %v907_v13 = vunpack.c.h.bf16 %v965_v61 }
  0x1e   :  { %v299_v7 = vmax.f32 %v235_v63, 0.0  ;;  %v237_v17 = vadd.f32 %v1176_v11, %v166_v8  ;;  %v197_v18 = vmul.f32 %v906_v9, %v1162_v5  ;;  %v847_v19 = vunpack.c.h.bf16 %v950_v2 }
  0x1f   :  { %1030 = vmatpush3.bf16.msra.mxu0 %v1118_v14  ;;  %1110 = vmatpush3.bf16.msra.mxu1 %v1118_v14  ;;  %v331_v10 = vmax.f32 %v267_v6, 0.0  ;;  %v846_v14 = vunpack.c.l.bf16 %v950_v2  ;;  %v198_v23 = vmul.f32 %v907_v13, %v1162_v5  ;;  %v910_v28 = vunpack.c.l.bf16 %v966_v15  ;;  %v953_v2 = vld [vmem:[%s1668_s0 + $0x50] sm:$0xff]  }
  0x20   :  { %v357_v16 = vpack.c.bf16 %v299_v7, %v298_v4  ;;  %v301_v25 = vmax.f32 %v237_v17, 0.0  ;;  %v268_v26 = vadd.f32 %v1176_v11, %v197_v18  ;;  %v168_v27 = vmul.f32 %v847_v19, %v1162_v5 }
  0x21   :  { %v167_v24 = vmul.f32 %v846_v14, %v1162_v5  ;;  %v911_v31 = vunpack.c.h.bf16 %v966_v15  ;;  %v199_v38 = vmul.f32 %v910_v28, %v1162_v5  ;;  %v915_v50 = vunpack.c.h.bf16 %v967_v33 }
  0x22   :  { %1032 = vmatmul.mubr.bf16.vlgmr.msra.gmra.mrb[0].mxu0 %v1213_v54  ;;  %1064 = vmatmul.mubr.bf16.vlgmr.msra.gmra.mrb[0].mxu1 %v1219_v59  ;;  %v165_v54 = vmul.f32 %v842_v55, %v1162_v5  ;;  %v330_v59 = vmax.f32 %v266_v0, 0.0  ;;  %v332_v36 = vmax.f32 %v268_v26, 0.0  ;;  %v239_v37 = vadd.f32 %v1176_v11, %v168_v27 }
  0x23   :  { %1035 = vmatprep.mubr.bf16.mxu0 %v354_v20  ;;  %1067 = vmatprep.mubr.bf16.mxu1 %v370_v29  ;;  %v951_v20 = vld [vmem:[%s1668_s0 + $0x40] sm:$0xff]   ;;  %v269_v29 = vadd.f32 %v1176_v11, %v198_v23  ;;  %v238_v30 = vadd.f32 %v1176_v11, %v167_v24  ;;  %v200_v41 = vmul.f32 %v911_v31, %v1162_v5  ;;  %v918_v1 = vunpack.c.l.bf16 %v968_v51 }
  0x24   :  { %v236_v12 = vadd.f32 %v1176_v11, %v165_v54  ;;  %v373_v21 = vpack.c.bf16 %v331_v10, %v330_v59  ;;  %v850_v32 = vunpack.c.l.bf16 %v951_v20  ;;  %v851_v42 = vunpack.c.h.bf16 %v951_v20  ;;  %v969_v10 = vld [vmem:[%s1668_s0 + $0xd0] sm:$0xff]   ;;  %v954_v20 = vld [vmem:[%s1668_s0 + $0x58] sm:$0xff]  }
  0x25   :  { %v333_v39 = vmax.f32 %v269_v29, 0.0  ;;  %v302_v40 = vmax.f32 %v238_v30, 0.0  ;;  %v303_v44 = vmax.f32 %v239_v37, 0.0  ;;  %v270_v45 = vadd.f32 %v1176_v11, %v199_v38 }
  0x26   :  { %v300_v22 = vmax.f32 %v236_v12, 0.0  ;;  %v169_v46 = vmul.f32 %v850_v32, %v1162_v5  ;;  %v271_v48 = vadd.f32 %v1176_v11, %v200_v41  ;;  %v170_v49 = vmul.f32 %v851_v42, %v1162_v5 }
  0x27   :  { %v374_v47 = vpack.c.bf16 %v333_v39, %v332_v36  ;;  %v359_v52 = vpack.c.bf16 %v303_v44, %v302_v40  ;;  %v334_v53 = vmax.f32 %v270_v45, 0.0  ;;  %v202_v60 = vmul.f32 %v915_v50, %v1162_v5  ;;  %v955_v44 = vld [vmem:[%s1668_s0 + $0x60] sm:$0xff]  }
  0x28   :  { %v358_v35 = vpack.c.bf16 %v301_v25, %v300_v22  ;;  %v240_v55 = vadd.f32 %v1176_v11, %v169_v46  ;;  %v335_v57 = vmax.f32 %v271_v48, 0.0  ;;  %v241_v58 = vadd.f32 %v1176_v11, %v170_v49 }
  0x29   :  { %v273_v6 = vadd.f32 %v1176_v11, %v202_v60  ;;  %v919_v8 = vunpack.c.h.bf16 %v968_v51  ;;  %v203_v9 = vmul.f32 %v918_v1, %v1162_v5  ;;  %v858_v15 = vunpack.c.l.bf16 %v953_v2  ;;  %v971_v51 = vld [vmem:[%s1668_s0 + $0xe0] sm:$0xff]  }
  0x2a   :  { %1036 = vmatmul.mubr.bf16.gmra.mrb[4].mxu0 %v1251_v34  ;;  %1068 = vmatmul.mubr.bf16.gmra.mrb[4].mxu1 %v371_v43  ;;  %v914_v34 = vunpack.c.l.bf16 %v967_v33  ;;  %v952_v43 = vld [vmem:[%s1668_s0 + $0x48] sm:$0xff]   ;;  %v305_v4 = vmax.f32 %v241_v58, 0.0  ;;  %v859_v19 = vunpack.c.h.bf16 %v953_v2  ;;  %v922_v24 = vunpack.c.l.bf16 %v969_v10  ;;  %v970_v33 = vld [vmem:[%s1668_s0 + $0xd8] sm:$0xff]  }
  0x2b   :  { %1039 = vmatprep.mubr.bf16.mxu0 %v356_v62  ;;  %1071 = vmatprep.mubr.bf16.mxu1 %v372_v3  ;;  %v854_v61 = vunpack.c.l.bf16 %v952_v43  ;;  %v304_v62 = vmax.f32 %v240_v55, 0.0  ;;  %v855_v0 = vunpack.c.h.bf16 %v952_v43  ;;  %v375_v3 = vpack.c.bf16 %v335_v57, %v334_v53  ;;  %v956_v2 = vld [vmem:[%s1668_s0 + $0x68] sm:$0xff]  }
  0x2c   :  { %v201_v56 = vmul.f32 %v914_v34, %v1162_v5  ;;  %v337_v13 = vmax.f32 %v273_v6, 0.0  ;;  %v204_v17 = vmul.f32 %v919_v8, %v1162_v5  ;;  %v274_v18 = vadd.f32 %v1176_v11, %v203_v9 }
  0x2d   :  { %v171_v54 = vmul.f32 %v854_v61, %v1162_v5  ;;  %v172_v59 = vmul.f32 %v855_v0, %v1162_v5  ;;  %v360_v12 = vpack.c.bf16 %v305_v4, %v304_v62  ;;  %v173_v23 = vmul.f32 %v858_v15, %v1162_v5 }
  0x2e   :  { %v272_v63 = vadd.f32 %v1176_v11, %v201_v56  ;;  %v275_v26 = vadd.f32 %v1176_v11, %v204_v17  ;;  %v338_v27 = vmax.f32 %v274_v18, 0.0  ;;  %v174_v28 = vmul.f32 %v859_v19, %v1162_v5  ;;  %v957_v19 = vld [vmem:[%s1668_s0 + $0x70] sm:$0xff]  }
  0x2f   :  { %v242_v14 = vadd.f32 %v1176_v11, %v171_v54  ;;  %v244_v29 = vadd.f32 %v1176_v11, %v173_v23  ;;  %v923_v30 = vunpack.c.h.bf16 %v969_v10  ;;  %v205_v31 = vmul.f32 %v922_v24, %v1162_v5 }
  0x30   :  { %v336_v7 = vmax.f32 %v272_v63, 0.0  ;;  %v862_v32 = vunpack.c.l.bf16 %v954_v20  ;;  %v339_v36 = vmax.f32 %v275_v26, 0.0  ;;  %v245_v37 = vadd.f32 %v1176_v11, %v174_v28  ;;  %v973_v28 = vld [vmem:[%s1668_s0 + $0xf0] sm:$0xff]  }
  0x31   :  { %v306_v22 = vmax.f32 %v242_v14, 0.0  ;;  %v863_v38 = vunpack.c.h.bf16 %v954_v20  ;;  %v308_v39 = vmax.f32 %v244_v29, 0.0  ;;  %v206_v40 = vmul.f32 %v923_v30, %v1162_v5 }
  0x32   :  { %1040 = vmatmul.mubr.bf16.gmra.mrb[8].mxu0 %v357_v16  ;;  %1072 = vmatmul.mubr.bf16.gmra.mrb[8].mxu1 %v373_v21  ;;  %v243_v16 = vadd.f32 %v1176_v11, %v172_v59  ;;  %v376_v21 = vpack.c.bf16 %v337_v13, %v336_v7  ;;  %v276_v41 = vadd.f32 %v1176_v11, %v205_v31  ;;  %v309_v46 = vmax.f32 %v245_v37, 0.0  ;;  %v972_v7 = vld [vmem:[%s1668_s0 + $0xe8] sm:$0xff]  }
  0x33   :  { %1043 = vmatprep.mubr.bf16.mxu0 %v358_v35  ;;  %1075 = vmatprep.mubr.bf16.mxu1 %v374_v47  ;;  %v175_v42 = vmul.f32 %v862_v32, %v1162_v5  ;;  %v377_v45 = vpack.c.bf16 %v339_v36, %v338_v27  ;;  %v176_v34 = vmul.f32 %v863_v38, %v1162_v5  ;;  %v926_v43 = vunpack.c.l.bf16 %v970_v33  ;;  %v958_v38 = vld [vmem:[%s1668_s0 + $0x78] sm:$0xff]  }
  0x34   :  { %v307_v25 = vmax.f32 %v243_v16, 0.0  ;;  %v277_v47 = vadd.f32 %v1176_v11, %v206_v40  ;;  %v340_v48 = vmax.f32 %v276_v41, 0.0  ;;  %v927_v50 = vunpack.c.h.bf16 %v970_v33 }
  0x35   :  { %v246_v49 = vadd.f32 %v1176_v11, %v175_v42  ;;  %v362_v53 = vpack.c.bf16 %v309_v46, %v308_v39  ;;  %v207_v55 = vmul.f32 %v926_v43, %v1162_v5  ;;  %v866_v56 = vunpack.c.l.bf16 %v955_v44 }
  0x36   :  { %v361_v35 = vpack.c.bf16 %v307_v25, %v306_v22  ;;  %v341_v57 = vmax.f32 %v277_v47, 0.0  ;;  %v208_v60 = vmul.f32 %v927_v50, %v1162_v5  ;;  %v867_v61 = vunpack.c.h.bf16 %v955_v44  ;;  %v974_v50 = vld [vmem:[%s1668_s0 + $0xf8] sm:$0xff]  }
  0x37   :  { %v310_v58 = vmax.f32 %v246_v49, 0.0  ;;  %v278_v63 = vadd.f32 %v1176_v11, %v207_v55  ;;  %v177_v0 = vmul.f32 %v866_v56, %v1162_v5  ;;  %v930_v1 = vunpack.c.l.bf16 %v971_v51 }
  0x38   :  { %v279_v4 = vadd.f32 %v1176_v11, %v208_v60  ;;  %v178_v6 = vmul.f32 %v867_v61, %v1162_v5  ;;  %v931_v54 = vunpack.c.h.bf16 %v971_v51  ;;  %v870_v14 = vunpack.c.l.bf16 %v956_v2 }
  0x39   :  { %v342_v59 = vmax.f32 %v278_v63, 0.0  ;;  %v248_v8 = vadd.f32 %v1176_v11, %v177_v0  ;;  %v209_v9 = vmul.f32 %v930_v1, %v1162_v5  ;;  %v871_v17 = vunpack.c.h.bf16 %v956_v2 }
  0x3a   :  { %1044 = vmatmul.mubr.bf16.gmra.mrb[12].mxu0 %v359_v52  ;;  %1076 = vmatmul.mubr.bf16.gmra.mrb[12].mxu1 %v375_v3  ;;  %v247_v52 = vadd.f32 %v1176_v11, %v176_v34  ;;  %v378_v3 = vpack.c.bf16 %v341_v57, %v340_v48  ;;  %v343_v10 = vmax.f32 %v279_v4, 0.0  ;;  %v210_v13 = vmul.f32 %v931_v54, %v1162_v5 }
  0x3b   :  { %1047 = vmatprep.mubr.bf16.mxu0 %v360_v12  ;;  %1079 = vmatprep.mubr.bf16.mxu1 %v376_v21  ;;  %v249_v12 = vadd.f32 %v1176_v11, %v178_v6  ;;  %v280_v16 = vadd.f32 %v1176_v11, %v209_v9  ;;  %v934_v18 = vunpack.c.l.bf16 %v972_v7  ;;  %v312_v20 = vmax.f32 %v248_v8, 0.0 }
  0x3c   :  { %v311_v62 = vmax.f32 %v247_v52, 0.0  ;;  %v281_v22 = vadd.f32 %v1176_v11, %v210_v13  ;;  %v179_v23 = vmul.f32 %v870_v14, %v1162_v5  ;;  %v180_v25 = vmul.f32 %v871_v17, %v1162_v5 }
  0x3d   :  { %v313_v21 = vmax.f32 %v249_v12, 0.0  ;;  %v344_v24 = vmax.f32 %v280_v16, 0.0  ;;  %v935_v26 = vunpack.c.h.bf16 %v972_v7  ;;  %v211_v27 = vmul.f32 %v934_v18, %v1162_v5 }
  0x3e   :  { %v363_v15 = vpack.c.bf16 %v311_v62, %v310_v58  ;;  %v379_v29 = vpack.c.bf16 %v343_v10, %v342_v59  ;;  %v345_v30 = vmax.f32 %v281_v22, 0.0  ;;  %v250_v31 = vadd.f32 %v1176_v11, %v179_v23 }
  0x3f   :  { %v874_v32 = vunpack.c.l.bf16 %v957_v19  ;;  %v251_v33 = vadd.f32 %v1176_v11, %v180_v25  ;;  %v282_v36 = vadd.f32 %v1176_v11, %v211_v27  ;;  %v875_v37 = vunpack.c.h.bf16 %v957_v19 }
  0x40   :  { %v364_v39 = vpack.c.bf16 %v313_v21, %v312_v20  ;;  %v380_v40 = vpack.c.bf16 %v345_v30, %v344_v24  ;;  %v938_v42 = vunpack.c.l.bf16 %v973_v28  ;;  %v314_v44 = vmax.f32 %v250_v31, 0.0 }
  0x41   :  { %v181_v41 = vmul.f32 %v874_v32, %v1162_v5  ;;  %v182_v34 = vmul.f32 %v875_v37, %v1162_v5  ;;  %v939_v47 = vunpack.c.h.bf16 %v973_v28  ;;  %v878_v49 = vunpack.c.l.bf16 %v958_v38 }
  0x42   :  { %1048 = vmatmul.mubr.bf16.gmra.mrb[16].mxu0 %v361_v35  ;;  %1080 = vmatmul.mubr.bf16.gmra.mrb[16].mxu1 %v377_v45  ;;  %v212_v35 = vmul.f32 %v935_v26, %v1162_v5  ;;  %v315_v45 = vmax.f32 %v251_v33, 0.0  ;;  %v213_v48 = vmul.f32 %v938_v42, %v1162_v5  ;;  %v346_v51 = vmax.f32 %v282_v36, 0.0 }
  0x43   :  { %1051 = vmatprep.mubr.bf16.mxu0 %v362_v53  ;;  %1083 = vmatprep.mubr.bf16.mxu1 %v378_v3  ;;  %v252_v43 = vadd.f32 %v1176_v11, %v181_v41  ;;  %v253_v52 = vadd.f32 %v1176_v11, %v182_v34  ;;  %v879_v55 = vunpack.c.h.bf16 %v958_v38  ;;  %v214_v57 = vmul.f32 %v939_v47, %v1162_v5 }
  0x44   :  { %v283_v46 = vadd.f32 %v1176_v11, %v212_v35  ;;  %v284_v58 = vadd.f32 %v1176_v11, %v213_v48  ;;  %v183_v60 = vmul.f32 %v878_v49, %v1162_v5  ;;  %v942_v63 = vunpack.c.l.bf16 %v974_v50 }
  0x45   :  { %v316_v56 = vmax.f32 %v252_v43, 0.0  ;;  %v317_v61 = vmax.f32 %v253_v52, 0.0  ;;  %v184_v62 = vmul.f32 %v879_v55, %v1162_v5  ;;  %v365_v0 = vpack.c.bf16 %v315_v45, %v314_v44 }
  0x46   :  { %v347_v53 = vmax.f32 %v283_v46, 0.0  ;;  %v285_v1 = vadd.f32 %v1176_v11, %v214_v57  ;;  %v348_v2 = vmax.f32 %v284_v58, 0.0  ;;  %v943_v3 = vunpack.c.h.bf16 %v974_v50 }
  0x47   :  { %v254_v6 = vadd.f32 %v1176_v11, %v183_v60  ;;  %v255_v54 = vadd.f32 %v1176_v11, %v184_v62  ;;  %v215_v7 = vmul.f32 %v942_v63, %v1162_v5  ;;  %v366_v59 = vpack.c.bf16 %v317_v61, %v316_v56 }
  0x48   :  { %v381_v4 = vpack.c.bf16 %v347_v53, %v346_v51  ;;  %v349_v8 = vmax.f32 %v285_v1, 0.0  ;;  %v216_v9 = vmul.f32 %v943_v3, %v1162_v5 }
  0x49   :  { %v286_v10 = vadd.f32 %v1176_v11, %v215_v7  ;;  %v318_v14 = vmax.f32 %v254_v6, 0.0 }
  0x4a   :  { %1052 = vmatmul.mubr.bf16.gmra.mrb[20].mxu0 %v363_v15  ;;  %1084 = vmatmul.mubr.bf16.gmra.mrb[20].mxu1 %v379_v29  ;;  %v382_v12 = vpack.c.bf16 %v349_v8, %v348_v2  ;;  %v287_v13 = vadd.f32 %v1176_v11, %v216_v9  ;;  %v319_v15 = vmax.f32 %v255_v54, 0.0 }
  0x4b   :  { %1055 = vmatprep.mubr.bf16.mxu0 %v364_v39  ;;  %1087 = vmatprep.mubr.bf16.mxu1 %v380_v40  ;;  %v350_v16 = vmax.f32 %v286_v10, 0.0 }
  0x4c   :  { %v351_v17 = vmax.f32 %v287_v13, 0.0  ;;  %v367_v18 = vpack.c.bf16 %v319_v15, %v318_v14 }
  0x4e   :  { %v383_v19 = vpack.c.bf16 %v351_v17, %v350_v16 }
  0x52   :  { %1056 = vmatmul.mubr.bf16.gmra.mrb[24].mxu0 %v365_v0  ;;  %1088 = vmatmul.mubr.bf16.gmra.mrb[24].mxu1 %v381_v4 }
  0x53   :  { %1059 = vmatprep.mubr.bf16.mxu0 %v366_v59  ;;  %1091 = vmatprep.mubr.bf16.mxu1 %v382_v12 }
  0x5a   :  { %1060 = vmatmul.mubr.bf16.gmra.mrb[28].mxu0 %v367_v18  ;;  %1092 = vmatmul.mubr.bf16.gmra.mrb[28].mxu1 %v383_v19 }
  0xf5   :  { %v1033_v20 = vpop.f32.mrb[0].mxu0  ;;  %v1065_v5 = vpop.f32.mrb[0].mxu1 }
  0xf6   :  { %740 = vst.msk [vmem:[%s1671_s4 + $0x10] sm:$0xff] %vm737_vm0, %v1033_v20  ;;  %772 = vst.msk [vmem:[%s1671_s4 + $0x110] sm:$0xff] %vm737_vm0, %v1065_v5  ;;  %v482_v11 = vpop.f32.mrb[1].mxu0  ;;  %v610_v21 = vpop.f32.mrb[1].mxu1 }
  0xf7   :  { %738 = vst.msk [vmem:[%s1671_s4] sm:$0xff] %vm737_vm0, %v482_v11  ;;  %770 = vst.msk [vmem:[%s1671_s4 + $0x100] sm:$0xff] %vm737_vm0, %v610_v21  ;;  %v1034_v22 = vpop.f32.mrb[2].mxu0  ;;  %v1066_v23 = vpop.f32.mrb[2].mxu1 }
  0xf8   :  { %741 = vst.msk [vmem:[%s1671_s4 + $0x18] sm:$0xff] %vm737_vm0, %v1034_v22  ;;  %773 = vst.msk [vmem:[%s1671_s4 + $0x118] sm:$0xff] %vm737_vm0, %v1066_v23  ;;  %v485_v24 = vpop.f32.mrb[3].mxu0  ;;  %v613_v25 = vpop.f32.mrb[3].mxu1 }
  0xf9   :  { %739 = vst.msk [vmem:[%s1671_s4 + $0x8] sm:$0xff] %vm737_vm0, %v485_v24  ;;  %771 = vst.msk [vmem:[%s1671_s4 + $0x108] sm:$0xff] %vm737_vm0, %v613_v25 }
  0xfd   :  { %v1037_v26 = vpop.f32.mrb[4].mxu0  ;;  %v1069_v27 = vpop.f32.mrb[4].mxu1 }
  0xfe   :  { %744 = vst.msk [vmem:[%s1671_s4 + $0x30] sm:$0xff] %vm737_vm0, %v1037_v26  ;;  %776 = vst.msk [vmem:[%s1671_s4 + $0x130] sm:$0xff] %vm737_vm0, %v1069_v27  ;;  %v498_v28 = vpop.f32.mrb[5].mxu0  ;;  %v626_v29 = vpop.f32.mrb[5].mxu1 }
  0xff   :  { %742 = vst.msk [vmem:[%s1671_s4 + $0x20] sm:$0xff] %vm737_vm0, %v498_v28  ;;  %774 = vst.msk [vmem:[%s1671_s4 + $0x120] sm:$0xff] %vm737_vm0, %v626_v29  ;;  %v1038_v30 = vpop.f32.mrb[6].mxu0  ;;  %v1070_v31 = vpop.f32.mrb[6].mxu1 }
 0x100   :  { %745 = vst.msk [vmem:[%s1671_s4 + $0x38] sm:$0xff] %vm737_vm0, %v1038_v30  ;;  %777 = vst.msk [vmem:[%s1671_s4 + $0x138] sm:$0xff] %vm737_vm0, %v1070_v31  ;;  %v501_v32 = vpop.f32.mrb[7].mxu0  ;;  %v629_v33 = vpop.f32.mrb[7].mxu1 }
 0x101   :  { %743 = vst.msk [vmem:[%s1671_s4 + $0x28] sm:$0xff] %vm737_vm0, %v501_v32  ;;  %775 = vst.msk [vmem:[%s1671_s4 + $0x128] sm:$0xff] %vm737_vm0, %v629_v33 }
 0x105   :  { %v1041_v35 = vpop.f32.mrb[8].mxu0  ;;  %v1073_v36 = vpop.f32.mrb[8].mxu1 }
 0x106   :  { %748 = vst.msk [vmem:[%s1671_s4 + $0x50] sm:$0xff] %vm737_vm0, %v1041_v35  ;;  %780 = vst.msk [vmem:[%s1671_s4 + $0x150] sm:$0xff] %vm737_vm0, %v1073_v36  ;;  %v514_v37 = vpop.f32.mrb[9].mxu0  ;;  %v642_v38 = vpop.f32.mrb[9].mxu1 }
 0x107   :  { %746 = vst.msk [vmem:[%s1671_s4 + $0x40] sm:$0xff] %vm737_vm0, %v514_v37  ;;  %778 = vst.msk [vmem:[%s1671_s4 + $0x140] sm:$0xff] %vm737_vm0, %v642_v38  ;;  %v1042_v39 = vpop.f32.mrb[10].mxu0  ;;  %v1074_v40 = vpop.f32.mrb[10].mxu1 }
 0x108   :  { %749 = vst.msk [vmem:[%s1671_s4 + $0x58] sm:$0xff] %vm737_vm0, %v1042_v39  ;;  %781 = vst.msk [vmem:[%s1671_s4 + $0x158] sm:$0xff] %vm737_vm0, %v1074_v40  ;;  %v517_v41 = vpop.f32.mrb[11].mxu0  ;;  %v645_v42 = vpop.f32.mrb[11].mxu1 }
 0x109   :  { %747 = vst.msk [vmem:[%s1671_s4 + $0x48] sm:$0xff] %vm737_vm0, %v517_v41  ;;  %779 = vst.msk [vmem:[%s1671_s4 + $0x148] sm:$0xff] %vm737_vm0, %v645_v42 }
 0x10d   :  { %v1045_v44 = vpop.f32.mrb[12].mxu0  ;;  %v1077_v45 = vpop.f32.mrb[12].mxu1 }
 0x10e   :  { %752 = vst.msk [vmem:[%s1671_s4 + $0x70] sm:$0xff] %vm737_vm0, %v1045_v44  ;;  %784 = vst.msk [vmem:[%s1671_s4 + $0x170] sm:$0xff] %vm737_vm0, %v1077_v45  ;;  %v530_v46 = vpop.f32.mrb[13].mxu0  ;;  %v658_v34 = vpop.f32.mrb[13].mxu1 }
 0x10f   :  { %750 = vst.msk [vmem:[%s1671_s4 + $0x60] sm:$0xff] %vm737_vm0, %v530_v46  ;;  %782 = vst.msk [vmem:[%s1671_s4 + $0x160] sm:$0xff] %vm737_vm0, %v658_v34  ;;  %v1046_v43 = vpop.f32.mrb[14].mxu0  ;;  %v1078_v47 = vpop.f32.mrb[14].mxu1 }
 0x110   :  { %753 = vst.msk [vmem:[%s1671_s4 + $0x78] sm:$0xff] %vm737_vm0, %v1046_v43  ;;  %785 = vst.msk [vmem:[%s1671_s4 + $0x178] sm:$0xff] %vm737_vm0, %v1078_v47  ;;  %v533_v48 = vpop.f32.mrb[15].mxu0  ;;  %v661_v49 = vpop.f32.mrb[15].mxu1 }
 0x111   :  { %751 = vst.msk [vmem:[%s1671_s4 + $0x68] sm:$0xff] %vm737_vm0, %v533_v48  ;;  %783 = vst.msk [vmem:[%s1671_s4 + $0x168] sm:$0xff] %vm737_vm0, %v661_v49 }
 0x115   :  { %v1049_v50 = vpop.f32.mrb[16].mxu0  ;;  %v1081_v51 = vpop.f32.mrb[16].mxu1 }
 0x116   :  { %756 = vst.msk [vmem:[%s1671_s4 + $0x90] sm:$0xff] %vm737_vm0, %v1049_v50  ;;  %788 = vst.msk [vmem:[%s1671_s4 + $0x190] sm:$0xff] %vm737_vm0, %v1081_v51  ;;  %v546_v53 = vpop.f32.mrb[17].mxu0  ;;  %v674_v52 = vpop.f32.mrb[17].mxu1 }
 0x117   :  { %754 = vst.msk [vmem:[%s1671_s4 + $0x80] sm:$0xff] %vm737_vm0, %v546_v53  ;;  %786 = vst.msk [vmem:[%s1671_s4 + $0x180] sm:$0xff] %vm737_vm0, %v674_v52  ;;  %v1050_v55 = vpop.f32.mrb[18].mxu0  ;;  %v1082_v56 = vpop.f32.mrb[18].mxu1 }
 0x118   :  { %757 = vst.msk [vmem:[%s1671_s4 + $0x98] sm:$0xff] %vm737_vm0, %v1050_v55  ;;  %789 = vst.msk [vmem:[%s1671_s4 + $0x198] sm:$0xff] %vm737_vm0, %v1082_v56  ;;  %v549_v57 = vpop.f32.mrb[19].mxu0  ;;  %v677_v58 = vpop.f32.mrb[19].mxu1 }
 0x119   :  { %755 = vst.msk [vmem:[%s1671_s4 + $0x88] sm:$0xff] %vm737_vm0, %v549_v57  ;;  %787 = vst.msk [vmem:[%s1671_s4 + $0x188] sm:$0xff] %vm737_vm0, %v677_v58 }
 0x11d   :  { %v1053_v60 = vpop.f32.mrb[20].mxu0  ;;  %v1085_v61 = vpop.f32.mrb[20].mxu1 }
 0x11e   :  { %760 = vst.msk [vmem:[%s1671_s4 + $0xb0] sm:$0xff] %vm737_vm0, %v1053_v60  ;;  %792 = vst.msk [vmem:[%s1671_s4 + $0x1b0] sm:$0xff] %vm737_vm0, %v1085_v61  ;;  %v562_v62 = vpop.f32.mrb[21].mxu0  ;;  %v690_v63 = vpop.f32.mrb[21].mxu1 }
 0x11f   :  { %758 = vst.msk [vmem:[%s1671_s4 + $0xa0] sm:$0xff] %vm737_vm0, %v562_v62  ;;  %790 = vst.msk [vmem:[%s1671_s4 + $0x1a0] sm:$0xff] %vm737_vm0, %v690_v63  ;;  %v1054_v0 = vpop.f32.mrb[22].mxu0  ;;  %v1086_v1 = vpop.f32.mrb[22].mxu1 }
 0x120   :  { %761 = vst.msk [vmem:[%s1671_s4 + $0xb8] sm:$0xff] %vm737_vm0, %v1054_v0  ;;  %793 = vst.msk [vmem:[%s1671_s4 + $0x1b8] sm:$0xff] %vm737_vm0, %v1086_v1  ;;  %v565_v2 = vpop.f32.mrb[23].mxu0  ;;  %v693_v3 = vpop.f32.mrb[23].mxu1 }
 0x121   :  { %759 = vst.msk [vmem:[%s1671_s4 + $0xa8] sm:$0xff] %vm737_vm0, %v565_v2  ;;  %791 = vst.msk [vmem:[%s1671_s4 + $0x1a8] sm:$0xff] %vm737_vm0, %v693_v3 }
 0x125   :  { %v1057_v4 = vpop.f32.mrb[24].mxu0  ;;  %v1089_v6 = vpop.f32.mrb[24].mxu1 }
 0x126   :  { %764 = vst.msk [vmem:[%s1671_s4 + $0xd0] sm:$0xff] %vm737_vm0, %v1057_v4  ;;  %796 = vst.msk [vmem:[%s1671_s4 + $0x1d0] sm:$0xff] %vm737_vm0, %v1089_v6  ;;  %v578_v54 = vpop.f32.mrb[25].mxu0  ;;  %v706_v7 = vpop.f32.mrb[25].mxu1 }
 0x127   :  { %762 = vst.msk [vmem:[%s1671_s4 + $0xc0] sm:$0xff] %vm737_vm0, %v578_v54  ;;  %794 = vst.msk [vmem:[%s1671_s4 + $0x1c0] sm:$0xff] %vm737_vm0, %v706_v7  ;;  %v1058_v59 = vpop.f32.mrb[26].mxu0  ;;  %v1090_v8 = vpop.f32.mrb[26].mxu1 }
 0x128   :  { %765 = vst.msk [vmem:[%s1671_s4 + $0xd8] sm:$0xff] %vm737_vm0, %v1058_v59  ;;  %797 = vst.msk [vmem:[%s1671_s4 + $0x1d8] sm:$0xff] %vm737_vm0, %v1090_v8  ;;  %v581_v9 = vpop.f32.mrb[27].mxu0  ;;  %v709_v10 = vpop.f32.mrb[27].mxu1 }
 0x129   :  { %763 = vst.msk [vmem:[%s1671_s4 + $0xc8] sm:$0xff] %vm737_vm0, %v581_v9  ;;  %795 = vst.msk [vmem:[%s1671_s4 + $0x1c8] sm:$0xff] %vm737_vm0, %v709_v10 }
 0x12d   :  { %v1061_v12 = vpop.f32.mrb[28].mxu0  ;;  %v1093_v13 = vpop.f32.mrb[28].mxu1 }
 0x12e   :  { %768 = vst.msk [vmem:[%s1671_s4 + $0xf0] sm:$0xff] %vm737_vm0, %v1061_v12  ;;  %800 = vst.msk [vmem:[%s1671_s4 + $0x1f0] sm:$0xff] %vm737_vm0, %v1093_v13  ;;  %v594_v14 = vpop.f32.mrb[29].mxu0  ;;  %v722_v15 = vpop.f32.mrb[29].mxu1 }
 0x12f   :  { %766 = vst.msk [vmem:[%s1671_s4 + $0xe0] sm:$0xff] %vm737_vm0, %v594_v14  ;;  %798 = vst.msk [vmem:[%s1671_s4 + $0x1e0] sm:$0xff] %vm737_vm0, %v722_v15  ;;  %v1062_v16 = vpop.f32.mrb[30].mxu0  ;;  %v1094_v17 = vpop.f32.mrb[30].mxu1 }
 0x130   :  { %769 = vst.msk [vmem:[%s1671_s4 + $0xf8] sm:$0xff] %vm737_vm0, %v1062_v16  ;;  %801 = vst.msk [vmem:[%s1671_s4 + $0x1f8] sm:$0xff] %vm737_vm0, %v1094_v17  ;;  %v597_v18 = vpop.f32.mrb[31].mxu0  ;;  %v725_v19 = vpop.f32.mrb[31].mxu1 }
 0x131   :  { %767 = vst.msk [vmem:[%s1671_s4 + $0xe8] sm:$0xff] %vm737_vm0, %v597_v18  ;;  %799 = vst.msk [vmem:[%s1671_s4 + $0x1e8] sm:$0xff] %vm737_vm0, %v725_v19 }

// kernel: bisenet_output_nchw.2
= control target key start
LH: loop header
LB: loop body
LE: loop exit
PB: predicated region body
PF: predicated region fallthrough
CT: control target
= control target key end

     0   :  { %s2269_s12 = smov 0   ;;  %s2271_s13 = smov 0   ;;  %s2821_s0 = inlined_call_operand.vmem [shape: bf16[2,18,18,8], index: 0, kind: input, shape index: {}]   ;;  %s2822_s1 = inlined_call_operand.vmem [shape: bf16[72,128], index: 1, kind: input, shape index: {}]   ;;  %s2823_s2 = inlined_call_operand.vmem [shape: bf16[2,1,256,128], index: 2, kind: output, shape index: {0}]   ;;  %s2824_s3 = inlined_call_operand.vmem [shape: f32[2,1,8,128], index: 3, kind: output, shape index: {1}]  }
   0x1   :  { %s2273_s14 = smov 0  }
   0x2 LB: > { %s26_s15 = sadd.s32 1, %s2235_s13  ;;  %p1844_p0 = scmp.ge.s32.totalorder %s2239_s14, 1  ;;  %s2239_s14 = sphi %s2273_s14, %s14_s14   ;;  %s2235_s13 = sphi %s2271_s13, %s2826_s13   ;;  %s2231_s12 = sphi %s2269_s12, %s2825_s12  }
   0x3   : > { %p28_p1 = scmp.ge.s32.totalorder %s26_s15, 2  ;;  %p156_p2 = scmp.lt.s32.totalorder %s2239_s14, 3 }
   0x5   : > { %s2828_s15 = smov (%p28_p1, %s26_s15), 0  ;;  %p157_p3 = pnand %p1844_p0, %p156_p2 }
   0x6   : > { %p191_p4 = scmp.lt.s32.totalorder (!%p157_p3), %s2231_s12, 1  ;;  %vm624_vm0 = vcmask (!%p157_p3), 1046528   ;;  %s2241_s20 = smov (!%p157_p3), 24   ;;  %vm399_vm1 = vsmask.f32 (!%p157_p3), 7424  ;;  %v2196_v44 = vld [vmem:[%s2822_s1] sm:$0xff] (!%p157_p3)  }
   0x7   : > { %160 = sbr.rel (%p157_p3) target bundleno = 626 (0x272), region = 28  ;;  %s2242_s21 = smov (!%p157_p3), 40   ;;  %2089 = vmatprep.subr.bf16.mxu0 (!%p157_p3), %v2196_v44  ;;  %v2197_v45 = vld [vmem:[%s2822_s1 + $0x8] sm:$0xff] (!%p157_p3)   ;;  %2131 = vmatprep.subr.bf16.mxu1 (!%p157_p3), %v2196_v44  ;;  %v2198_v47 = vld [vmem:[%s2822_s1 + $0x10] sm:$0xff] (!%p157_p3)   ;;  %v2200_v51 = vld [vmem:[%s2822_s1 + $0x18] sm:$0xff] (!%p157_p3)   ;;  %vm1276_vm2 = vcmask (!%p157_p3), 1043456  }
   0x8   : > { %s2243_s22 = smov (!%p157_p3), 16   ;;  %s2244_s23 = smov (!%p157_p3), 8   ;;  %2090 = vmatpush3.bf16.msra.mxu0 (!%p157_p3), %v2196_v44  ;;  %2136 = vmatpush3.bf16.msra.mxu1 (!%p157_p3), %v2196_v44  ;;  %v2202_v55 = vld [vmem:[%s2822_s1 + $0x20] ss:$0 sps:$4 sm:$0xff] (!%p157_p3)   ;;  %vm943_vm3 = vcmask (!%p157_p3), 64512   ;;  %vm976_vm4 = vcmask (!%p157_p3), 130048  }
   0x9   : > { %s2245_s24 = smov (!%p157_p3), 32   ;;  %s2246_s27 = smov (!%p157_p3), 48   ;;  %2091 = vmatprep.subr.bf16.mxu0 (!%p157_p3), %v2197_v45  ;;  %2132 = vmatprep.subr.bf16.mxu1 (!%p157_p3), %v2197_v45  ;;  %v1278_v59 = vsel (!%p157_p3), %vm1276_vm2, %v2202_v55, 0  ;;  %vm1009_vm5 = vcmask (!%p157_p3), 195584   ;;  %vm1042_vm6 = vcmask (!%p157_p3), 261120   ;;  %vm1075_vm7 = vcmask (!%p157_p3), 326656  }
   0xa   : > { %s2247_s5 = smov (!%p157_p3), 56   ;;  %s2248_s8 = smov (!%p157_p3), 64   ;;  %vm1108_vm8 = vcmask (!%p157_p3), 392192   ;;  %vm1141_vm9 = vcmask (!%p157_p3), 457728   ;;  %vm1174_vm10 = vcmask (!%p157_p3), 523264   ;;  %vm1243_vm11 = vcmask (!%p157_p3), 588800  }
   0xc   : > { %2092 = vmatpush3.bf16.msra.mxu0 (!%p157_p3), %v2197_v45  ;;  %2137 = vmatpush3.bf16.msra.mxu1 (!%p157_p3), %v2197_v45 }
   0xd   : > { %2093 = vmatprep.subr.bf16.mxu0 (!%p157_p3), %v2198_v47  ;;  %2133 = vmatprep.subr.bf16.mxu1 (!%p157_p3), %v2198_v47 }
   0xe   : > { %s2830_s12 = smov (!%p191_p4, %s2231_s12), 1 }
   0xf   : > { %s2143_s16 = smul.u32 216, %s2830_s12  ;;  %s1940_s11 = sshll.u32 %s2830_s12, 7 }
  0x10   : > { %2094 = vmatpush3.bf16.msra.mxu0 %v2198_v47  ;;  %2138 = vmatpush3.bf16.msra.mxu1 %v2198_v47  ;;  %s2778_s18 = scalar_lea.vmem %s2823_s2, %s1940_s11 }
  0x11   : > { %s2293_s19 = scalar_lea.vmem %s2821_s0, %s2143_s16  ;;  %2095 = vmatprep.subr.bf16.mxu0 %v2200_v51  ;;  %2134 = vmatprep.subr.bf16.mxu1 %v2200_v51 }
  0x12   : > { %v2296_v0 = vld [vmem:[%s2293_s19 + $0x18] sm:$0xff]   ;;  %v2299_v1 = vld [vmem:[%s2293_s19 + $0xc] sm:$0xff]   ;;  %v2178_v2 = vld [vmem:[%s2293_s19 + $0x14] ss:$0 sps:$4 sm:$0x11]  }
  0x13   : > { %712 = vrot.lane.b32.xlu1 %v2296_v0, %s2241_s20  ;;  %v2305_v3 = vld [vmem:[%s2293_s19] sm:$0xff]   ;;  %710 = vrot.lane.b32.xlu0 %v2299_v1, %s2241_s20  ;;  %v628_v4 = vrot.slane %v2299_v1, 1  ;;  %v629_v5 = vrot.slane %v2178_v2, 1  ;;  %v2180_v6 = vld [vmem:[%s2293_s19 + $0x8] ss:$0 sps:$4 sm:$0x11]  }
  0x14   : > { %v625_v7 = vrot.slane %v2305_v3, 1  ;;  %v401_v8 = vshrl.u32 %v2305_v3, 16  ;;  %v403_v9 = vshll.u32 %v2305_v3, 16  ;;  %v413_v10 = vshrl.u32 %v2299_v1, 16  ;;  %v2325_v30 = vld [vmem:[%s2293_s19 + $0x24] sm:$0xff]   ;;  %v2358_v50 = vld [vmem:[%s2293_s19 + $0x30] sm:$0xff]   ;;  %2096 = vmatpush3.bf16.msra.mxu0 %v2200_v51  ;;  %2139 = vmatpush3.bf16.msra.mxu1 %v2200_v51 }
  0x15   : > { %v630_v11 = vsel %vm624_vm0, %v628_v4, %v629_v5  ;;  %v626_v12 = vrot.slane %v2180_v6, 1  ;;  %v408_v13 = vshll.u32 %v2180_v6, 16  ;;  %v2181_v14 = vld [vmem:[%s2293_s19 + $0x20] ss:$0 sps:$4 sm:$0x11]   ;;  %v415_v15 = vshll.u32 %v2299_v1, 16  ;;  %2141 = vmatprep.subr.msk.bf16.mxu0 %vm1276_vm2, %v2202_v55  ;;  %2142 = vmatprep.subr.msk.bf16.mxu1 %vm1276_vm2, %v2202_v55 }
  0x16   : > { %v405_v16 = vrot.slane %v403_v9, 1  ;;  %v420_v17 = vshll.u32 %v2178_v2, 16  ;;  %v427_v18 = vshll.u32 %v2296_v0, 16  ;;  %v631_v23 = vrot.slane %v2296_v0, 1  ;;  %v2377_v62 = vld [vmem:[%s2293_s19 + $0x3c] sm:$0xff]   ;;  %v2453_v51 = vld [vmem:[%s2293_s19 + $0x6c] sm:$0xff]  }
  0x17   : > { %792 = vrot.lane.b32.xlu0 %v630_v11, %s2242_s21  ;;  %v627_v19 = vsel %vm624_vm0, %v625_v7, %v626_v12  ;;  %v410_v20 = vrot.slane %v408_v13, 1  ;;  %v417_v21 = vrot.slane %v415_v15, 1  ;;  %v425_v25 = vshrl.u32 %v2296_v0, 16  ;;  %v2183_v33 = vld [vmem:[%s2293_s19 + $0x2c] ss:$0 sps:$4 sm:$0x11]  }
  0x18   : > { %673 = vrot.lane.b32.xlu1 %v627_v19, %s2243_s22  ;;  %v406_v22 = vor.u32 %v405_v16, %v401_v8  ;;  %v422_v24 = vrot.slane %v420_v17, 1  ;;  %v632_v26 = vrot.slane %v2181_v14, 1  ;;  %v429_v28 = vrot.slane %v427_v18, 1  ;;  %v2185_v53 = vld [vmem:[%s2293_s19 + $0x38] ss:$0 sps:$4 sm:$0x11]   ;;  %2098 = vmatpush3.bf16.msra.mxu0 %v1278_v59 }
  0x19   : > { %v418_v27 = vor.u32 %v417_v21, %v413_v10  ;;  %v432_v29 = vshll.u32 %v2181_v14, 16  ;;  %v439_v37 = vshll.u32 %v2325_v30, 16  ;;  %v437_v39 = vshrl.u32 %v2325_v30, 16  ;;  %2140 = vmatpush3.bf16.msra.mxu1 %v1278_v59  ;;  %v2187_v5 = vld [vmem:[%s2293_s19 + $0x44] ss:$0 sps:$4 sm:$0x11]  }
  0x1a   : > { %v411_v31 = vsel %vm399_vm1, %v406_v22, %v410_v20  ;;  %v633_v34 = vsel %vm624_vm0, %v631_v23, %v632_v26  ;;  %v430_v35 = vor.u32 %v429_v28, %v425_v25  ;;  %v444_v41 = vshll.u32 %v2183_v33, 16  ;;  %v2402_v16 = vld [vmem:[%s2293_s19 + $0x48] sm:$0xff]   ;;  %v2189_v18 = vld [vmem:[%s2293_s19 + $0x50] ss:$0 sps:$4 sm:$0x11]   ;;  %v2415_v25 = vld [vmem:[%s2293_s19 + $0x54] sm:$0xff]  }
  0x1b   : > { %592 = vrot.lane.b32.xlu0 %v411_v31, %s2244_s23  ;;  %v423_v32 = vsel %vm399_vm1, %v418_v27, %v422_v24  ;;  %v434_v36 = vrot.slane %v432_v29, 1  ;;  %v441_v40 = vrot.slane %v439_v37, 1  ;;  %v634_v48 = vrot.slane %v2325_v30, 1  ;;  %v2191_v29 = vld [vmem:[%s2293_s19 + $0x5c] ss:$0 sps:$4 sm:$0x11]  }
  0x1c   : > { %675 = vrot.lane.b32.xlu1 %v630_v11, %s2243_s22  ;;  %v446_v43 = vrot.slane %v444_v41, 1  ;;  %v635_v49 = vrot.slane %v2183_v33, 1  ;;  %v451_v54 = vshll.u32 %v2358_v50, 16  ;;  %v449_v56 = vshrl.u32 %v2358_v50, 16  ;;  %v2440_v41 = vld [vmem:[%s2293_s19 + $0x60] sm:$0xff]  }
  0x1d   : > { %v435_v38 = vsel %vm399_vm1, %v430_v35, %v434_v36  ;;  %v442_v42 = vor.u32 %v441_v40, %v437_v39  ;;  %v456_v58 = vshll.u32 %v2185_v53, 16  ;;  %v637_v2 = vrot.slane %v2358_v50, 1  ;;  %v2195_v55 = vld [vmem:[%s2293_s19 + $0x74] ss:$0 sps:$4 sm:$0x11]  }
  0x1e   : > { %v636_v52 = vsel %vm624_vm0, %v634_v48, %v635_v49  ;;  %v453_v57 = vrot.slane %v451_v54, 1  ;;  %v638_v4 = vrot.slane %v2185_v53, 1  ;;  %v463_v6 = vshll.u32 %v2377_v62, 16 }
  0x1f   : > { %594 = vrot.lane.b32.xlu0 %v423_v32, %s2244_s23  ;;  %v447_v46 = vsel %vm399_vm1, %v442_v42, %v446_v43  ;;  %v458_v61 = vrot.slane %v456_v58, 1  ;;  %v461_v8 = vshrl.u32 %v2377_v62, 16  ;;  %v468_v10 = vshll.u32 %v2187_v5, 16  ;;  %v2193_v43 = vld [vmem:[%s2293_s19 + $0x68] ss:$0 sps:$4 sm:$0x11]  }
  0x20   : > { %794 = vrot.lane.b32.xlu1 %v633_v34, %s2242_s21  ;;  %v454_v60 = vor.u32 %v453_v57, %v449_v56  ;;  %v639_v7 = vsel %vm624_vm0, %v637_v2, %v638_v4  ;;  %v465_v9 = vrot.slane %v463_v6, 1  ;;  %v640_v14 = vrot.slane %v2377_v62, 1 }
  0x21   : > { %v470_v12 = vrot.slane %v468_v10, 1  ;;  %v641_v15 = vrot.slane %v2187_v5, 1  ;;  %v475_v19 = vshll.u32 %v2402_v16, 16  ;;  %v473_v20 = vshrl.u32 %v2402_v16, 16 }
  0x22   : > { %v459_v63 = vsel %vm399_vm1, %v454_v60, %v458_v61  ;;  %v466_v11 = vor.u32 %v465_v9, %v461_v8  ;;  %v480_v22 = vshll.u32 %v2189_v18, 16  ;;  %v643_v27 = vrot.slane %v2402_v16, 1 }
  0x23   : > { %757 = vrot.lane.b32.xlu0 %v423_v32, %s2245_s24  ;;  %v642_v17 = vsel %vm624_vm0, %v640_v14, %v641_v15  ;;  %v477_v21 = vrot.slane %v475_v19, 1  ;;  %v644_v28 = vrot.slane %v2189_v18, 1  ;;  %v487_v31 = vshll.u32 %v2415_v25, 16  ;;  %v2201_v15 = vld [vmem:[%s2293_s19 + $0x80] ss:$0 sps:$4 sm:$0x11]  }
  0x24   : > { %759 = vrot.lane.b32.xlu1 %v435_v38, %s2245_s24  ;;  %v471_v13 = vsel %vm399_vm1, %v466_v11, %v470_v12  ;;  %v482_v24 = vrot.slane %v480_v22, 1  ;;  %v485_v33 = vshrl.u32 %v2415_v25, 16  ;;  %v492_v35 = vshll.u32 %v2191_v29, 16  ;;  %v2478_v11 = vld [vmem:[%s2293_s19 + $0x78] sm:$0xff]  }
  0x25   : > { %v478_v23 = vor.u32 %v477_v21, %v473_v20  ;;  %v645_v32 = vsel %vm624_vm0, %v643_v27, %v644_v28  ;;  %v646_v39 = vrot.slane %v2415_v25, 1  ;;  %v647_v40 = vrot.slane %v2191_v29, 1 }
  0x26   : > { %v494_v37 = vrot.slane %v492_v35, 1  ;;  %v499_v44 = vshll.u32 %v2440_v41, 16  ;;  %v497_v45 = vshrl.u32 %v2440_v41, 16  ;;  %v504_v47 = vshll.u32 %v2193_v43, 16 }
  0x27   : > { %829 = vrot.lane.b32.xlu0 %v2296_v0, %s2246_s27  ;;  %v483_v26 = vsel %vm399_vm1, %v478_v23, %v482_v24  ;;  %v648_v42 = vsel %vm624_vm0, %v646_v39, %v647_v40  ;;  %v649_v53 = vrot.slane %v2440_v41, 1  ;;  %v650_v54 = vrot.slane %v2193_v43, 1  ;;  %v2204_v40 = vld [vmem:[%s2293_s19 + $0x8c] ss:$0 sps:$4 sm:$0x11]  }
  0x28   : > { %831 = vrot.lane.b32.xlu1 %v2325_v30, %s2246_s27  ;;  %v506_v49 = vrot.slane %v504_v47, 1  ;;  %v511_v56 = vshll.u32 %v2453_v51, 16  ;;  %v509_v58 = vshrl.u32 %v2453_v51, 16  ;;  %v516_v60 = vshll.u32 %v2195_v55, 16 }
  0x29   : > { %v651_v57 = vsel %vm624_vm0, %v649_v53, %v650_v54  ;;  %v652_v8 = vrot.slane %v2453_v51, 1  ;;  %v653_v9 = vrot.slane %v2195_v55, 1  ;;  %v521_v21 = vshrl.u32 %v2478_v11, 16 }
  0x2a   : > { %v513_v59 = vrot.slane %v511_v56, 1  ;;  %v518_v4 = vrot.slane %v516_v60, 1  ;;  %v528_v23 = vshll.u32 %v2201_v15, 16  ;;  %v655_v35 = vrot.slane %v2478_v11, 1 }
  0x2b   : > { %876 = vrot.lane.b32.xlu0 %v435_v38, %s2247_s5  ;;  %v540_v54 = vshll.u32 %v2204_v40, 16 }
  0x2c   : > { %878 = vrot.lane.b32.xlu1 %v447_v46, %s2247_s5  ;;  %v514_v2 = vor.u32 %v513_v59, %v509_v58 }
  0x2e   : > { %v519_v6 = vsel %vm399_vm1, %v514_v2, %v518_v4 }
  0x2f   : > { %911 = vrot.lane.b32.xlu0 %v633_v34, %s2248_s8 }
  0x30   : > { %596 = vrot.lane.b32.xlu1 %v435_v38, %s2244_s23 }
  0x33   : > { %913 = vrot.lane.b32.xlu0 %v636_v52, %s2248_s8 }
  0x34   : > { %598 = vrot.lane.b32.xlu1 %v447_v46, %s2244_s23 }
  0x37   : > { %677 = vrot.lane.b32.xlu0 %v633_v34, %s2243_s22  ;;  %v489_v34 = vrot.slane %v487_v31, 1  ;;  %v2496_v31 = vld [vmem:[%s2293_s19 + $0x84] sm:$0xff]  }
  0x38   : > { %679 = vrot.lane.b32.xlu1 %v636_v52, %s2243_s22 }
  0x39   : > { %v490_v36 = vor.u32 %v489_v34, %v485_v33 }
  0x3b   : > { %714 = vrot.lane.b32.xlu0 %v2325_v30, %s2241_s20  ;;  %v495_v38 = vsel %vm399_vm1, %v490_v36, %v494_v37  ;;  %v656_v36 = vrot.slane %v2201_v15, 1 }
  0x3c   : > { %716 = vrot.lane.b32.xlu1 %v2358_v50, %s2241_s20 }
  0x3d   : > { %v657_v47 = vsel %vm624_vm0, %v655_v35, %v656_v36 }
  0x3f   : > { %761 = vrot.lane.b32.xlu0 %v447_v46, %s2245_s24  ;;  %v501_v46 = vrot.slane %v499_v44, 1 }
  0x40   : > { %763 = vrot.lane.b32.xlu1 %v459_v63, %s2245_s24 }
  0x41   : > { %v502_v48 = vor.u32 %v501_v46, %v497_v45 }
  0x43   : > { %796 = vrot.lane.b32.xlu0 %v636_v52, %s2242_s21  ;;  %v507_v52 = vsel %vm399_vm1, %v502_v48, %v506_v49 }
  0x44   : > { %798 = vrot.lane.b32.xlu1 %v639_v7, %s2242_s21 }
  0x47   : > { %833 = vrot.lane.b32.xlu0 %v2358_v50, %s2246_s27 }
  0x48   : > { %835 = vrot.lane.b32.xlu1 %v2377_v62, %s2246_s27 }
  0x4b   : > { %880 = vrot.lane.b32.xlu0 %v459_v63, %s2247_s5 }
  0x4c   : > { %882 = vrot.lane.b32.xlu1 %v471_v13, %s2247_s5 }
  0x4f   : > { %915 = vrot.lane.b32.xlu0 %v639_v7, %s2248_s8 }
  0x50   : > { %600 = vrot.lane.b32.xlu1 %v459_v63, %s2244_s23 }
  0x53   : > { %917 = vrot.lane.b32.xlu0 %v642_v17, %s2248_s8 }
  0x54   : > { %602 = vrot.lane.b32.xlu1 %v471_v13, %s2244_s23 }
  0x57   : > { %681 = vrot.lane.b32.xlu0 %v639_v7, %s2243_s22 }
  0x58   : > { %683 = vrot.lane.b32.xlu1 %v642_v17, %s2243_s22 }
  0x5b   : > { %718 = vrot.lane.b32.xlu0 %v2377_v62, %s2241_s20 }
  0x5c   : > { %720 = vrot.lane.b32.xlu1 %v2402_v16, %s2241_s20 }
  0x5f   : > { %765 = vrot.lane.b32.xlu0 %v471_v13, %s2245_s24  ;;  %v654_v13 = vsel %vm624_vm0, %v652_v8, %v653_v9  ;;  %v658_v8 = vrot.slane %v2496_v31, 1  ;;  %v659_v9 = vrot.slane %v2204_v40, 1 }
  0x60   : > { %767 = vrot.lane.b32.xlu1 %v483_v26, %s2245_s24 }
  0x63   : > { %800 = vrot.lane.b32.xlu0 %v642_v17, %s2242_s21  ;;  %v523_v17 = vshll.u32 %v2478_v11, 16 }
  0x64   : > { %802 = vrot.lane.b32.xlu1 %v645_v32, %s2242_s21 }
  0x65   : > { %v525_v22 = vrot.slane %v523_v17, 1  ;;  %v2206_v17 = vld [vmem:[%s2293_s19 + $0x98] ss:$0 sps:$4 sm:$0x11]  }
  0x67   : > { %837 = vrot.lane.b32.xlu0 %v2402_v16, %s2246_s27  ;;  %v526_v29 = vor.u32 %v525_v22, %v521_v21 }
  0x68   : > { %839 = vrot.lane.b32.xlu1 %v2415_v25, %s2246_s27 }
  0x6b   : > { %884 = vrot.lane.b32.xlu0 %v483_v26, %s2247_s5 }
  0x6c   : > { %886 = vrot.lane.b32.xlu1 %v495_v38, %s2247_s5 }
  0x6f   : > { %919 = vrot.lane.b32.xlu0 %v645_v32, %s2248_s8 }
  0x70   : > { %604 = vrot.lane.b32.xlu1 %v483_v26, %s2244_s23 }
  0x73   : > { %921 = vrot.lane.b32.xlu0 %v648_v42, %s2248_s8 }
  0x74   : > { %606 = vrot.lane.b32.xlu1 %v495_v38, %s2244_s23 }
  0x77   : > { %685 = vrot.lane.b32.xlu0 %v645_v32, %s2243_s22 }
  0x78   : > { %687 = vrot.lane.b32.xlu1 %v648_v42, %s2243_s22 }
  0x7b   : > { %722 = vrot.lane.b32.xlu0 %v2415_v25, %s2241_s20 }
  0x7c   : > { %724 = vrot.lane.b32.xlu1 %v2440_v41, %s2241_s20 }
  0x7f   : > { %769 = vrot.lane.b32.xlu0 %v495_v38, %s2245_s24 }
  0x80   : > { %771 = vrot.lane.b32.xlu1 %v507_v52, %s2245_s24 }
  0x83   : > { %804 = vrot.lane.b32.xlu0 %v648_v42, %s2242_s21  ;;  %v535_v42 = vshll.u32 %v2496_v31, 16 }
  0x84   : > { %806 = vrot.lane.b32.xlu1 %v651_v57, %s2242_s21 }
  0x85   : > { %v713_v61 = vpop.permute.xlu1 %712  ;;  %v711_v63 = vpop.permute.xlu0 %710  ;;  %v537_v53 = vrot.slane %v535_v42, 1 }
  0x87   : > { %841 = vrot.lane.b32.xlu0 %v2440_v41, %s2246_s27 }
  0x88   : > { %843 = vrot.lane.b32.xlu1 %v2453_v51, %s2246_s27 }
  0x89   : > { %v793_v5 = vpop.permute.xlu0 %792 }
  0x8a   : > { %v674_v7 = vpop.permute.xlu1 %673 }
  0x8b   : > { %888 = vrot.lane.b32.xlu0 %v507_v52, %s2247_s5 }
  0x8c   : > { %890 = vrot.lane.b32.xlu1 %v519_v6, %s2247_s5 }
  0x8d   : > { %v593_v10 = vpop.permute.xlu0 %592 }
  0x8e   : > { %v676_v12 = vpop.permute.xlu1 %675  ;;  %v945_v19 = vsel %vm943_vm3, %v2305_v3, %v593_v10  ;;  %v530_v3 = vrot.slane %v528_v23, 1  ;;  %v552_v23 = vshll.u32 %v2206_v17, 16 }
  0x8f   : > { %923 = vrot.lane.b32.xlu0 %v651_v57, %s2248_s8  ;;  %v978_v27 = vsel %vm976_vm4, %v945_v19, %v674_v7 }
  0x90   : > { %608 = vrot.lane.b32.xlu1 %v507_v52, %s2244_s23  ;;  %v1011_v34 = vsel %vm1009_vm5, %v978_v27, %v711_v63  ;;  %v531_v39 = vsel %vm399_vm1, %v526_v29, %v530_v3  ;;  %v533_v52 = vshrl.u32 %v2496_v31, 16  ;;  %v542_v63 = vrot.slane %v540_v54, 1  ;;  %v2549_v29 = vld [vmem:[%s2293_s19 + $0x9c] sm:$0xff]  }
  0x91   : > { %v595_v14 = vpop.permute.xlu0 %594 }
  0x92   : > { %v795_v18 = vpop.permute.xlu1 %794  ;;  %v947_v26 = vsel %vm943_vm3, %v2299_v1, %v595_v14  ;;  %v660_v14 = vsel %vm624_vm0, %v658_v8, %v659_v9  ;;  %v664_v8 = vrot.slane %v2549_v29, 1 }
  0x93   : > { %925 = vrot.lane.b32.xlu0 %v654_v13, %s2248_s8  ;;  %v980_v32 = vsel %vm976_vm4, %v947_v26, %v676_v12  ;;  %v2536_v12 = vld [vmem:[%s2293_s19 + $0x90] sm:$0xff]  }
  0x94   : > { %610 = vrot.lane.b32.xlu1 %v519_v6, %s2244_s23  ;;  %v1013_v37 = vsel %vm1009_vm5, %v980_v32, %v713_v61  ;;  %v538_v61 = vor.u32 %v537_v53, %v533_v52  ;;  %v545_v21 = vshrl.u32 %v2536_v12, 16 }
  0x95   : > { %v758_v20 = vpop.permute.xlu0 %757 }
  0x96   : > { %v760_v24 = vpop.permute.xlu1 %759  ;;  %v1044_v1 = vsel %vm1042_vm6, %v1011_v34, %v758_v20  ;;  %v661_v34 = vrot.slane %v2536_v12, 1 }
  0x97   : > { %689 = vrot.lane.b32.xlu0 %v651_v57, %s2243_s22  ;;  %v1077_v44 = vsel %vm1075_vm7, %v1044_v1, %v793_v5  ;;  %v1046_v45 = vsel %vm1042_vm6, %v1013_v37, %v760_v24  ;;  %v662_v1 = vrot.slane %v2206_v17, 1 }
  0x98   : > { %691 = vrot.lane.b32.xlu1 %v654_v13, %s2243_s22  ;;  %v1079_v57 = vsel %vm1075_vm7, %v1046_v45, %v795_v18  ;;  %v547_v18 = vshll.u32 %v2536_v12, 16 }
  0x99   : > { %v830_v28 = vpop.permute.xlu0 %829 }
  0x9a   : > { %v832_v33 = vpop.permute.xlu1 %831  ;;  %v1110_v46 = vsel %vm1108_vm8, %v1077_v44, %v830_v28  ;;  %v549_v22 = vrot.slane %v547_v18, 1  ;;  %v554_v28 = vrot.slane %v552_v23, 1  ;;  %v2210_v18 = vld [vmem:[%s2293_s19 + $0xb0] ss:$0 sps:$4 sm:$0x11]  }
  0x9b   : > { %726 = vrot.lane.b32.xlu0 %v2453_v51, %s2241_s20  ;;  %v1112_v58 = vsel %vm1108_vm8, %v1079_v57, %v832_v33 }
  0x9c   : > { %728 = vrot.lane.b32.xlu1 %v2478_v11, %s2241_s20  ;;  %v550_v27 = vor.u32 %v549_v22, %v545_v21 }
  0x9d   : > { %v877_v38 = vpop.permute.xlu0 %876 }
  0x9e   : > { %v879_v43 = vpop.permute.xlu1 %878  ;;  %v1143_v48 = vsel %vm1141_vm9, %v1110_v46, %v877_v38  ;;  %v555_v37 = vsel %vm399_vm1, %v550_v27, %v554_v28  ;;  %v2208_v38 = vld [vmem:[%s2293_s19 + $0xa4] ss:$0 sps:$4 sm:$0x11]   ;;  %v663_v46 = vsel %vm624_vm0, %v661_v34, %v662_v1 }
  0x9f   : > { %773 = vrot.lane.b32.xlu0 %v519_v6, %s2245_s24  ;;  %v1145_v59 = vsel %vm1141_vm9, %v1112_v58, %v879_v43  ;;  %v543_v6 = vsel %vm399_vm1, %v538_v61, %v542_v63  ;;  %v564_v53 = vshll.u32 %v2208_v38, 16  ;;  %v665_v9 = vrot.slane %v2208_v38, 1 }
  0xa0   : > { %775 = vrot.lane.b32.xlu1 %v531_v39, %s2245_s24 }
  0xa1   : > { %v912_v49 = vpop.permute.xlu0 %911  ;;  %v566_v63 = vrot.slane %v564_v53, 1 }
  0xa2   : > { %v597_v55 = vpop.permute.xlu1 %596  ;;  %v1176_v56 = vsel %vm1174_vm10, %v1143_v48, %v912_v49 }
  0xa3   : > { %808 = vrot.lane.b32.xlu0 %v654_v13, %s2242_s21  ;;  %2099 = vmatprep.mubr.msk.bf16.mxu0 %vm1243_vm11, %v1176_v56  ;;  %v949_v32 = vsel %vm943_vm3, %v2296_v0, %v597_v55 }
  0xa4   : > { %810 = vrot.lane.b32.xlu1 %v657_v47, %s2242_s21 }
  0xa5   : > { %v914_v60 = vpop.permute.xlu0 %913 }
  0xa6   : > { %v599_v2 = vpop.permute.xlu1 %598  ;;  %v1178_v4 = vsel %vm1174_vm10, %v1145_v59, %v914_v60 }
  0xa7   : > { %845 = vrot.lane.b32.xlu0 %v2478_v11, %s2246_s27  ;;  %2100 = vmatmul.mubr.msk.bf16.vlgmr.msra.gmra.mrb[0].mxu0 %vm1243_vm11, %v1178_v4  ;;  %v951_v42 = vsel %vm943_vm3, %v2325_v30, %v599_v2 }
  0xa8   : > { %847 = vrot.lane.b32.xlu1 %v2496_v31, %s2246_s27 }
  0xa9   : > { %v678_v5 = vpop.permute.xlu0 %677 }
  0xaa   : > { %v680_v7 = vpop.permute.xlu1 %679  ;;  %v982_v33 = vsel %vm976_vm4, %v949_v32, %v678_v5  ;;  %v2607_v32 = vld [vmem:[%s2293_s19 + $0xb4] sm:$0xff]  }
  0xab   : > { %892 = vrot.lane.b32.xlu0 %v531_v39, %s2247_s5  ;;  %v984_v44 = vsel %vm976_vm4, %v951_v42, %v680_v7 }
  0xac   : > { %894 = vrot.lane.b32.xlu1 %v543_v6, %s2247_s5 }
  0xad   : > { %v715_v10 = vpop.permute.xlu0 %714 }
  0xae   : > { %v717_v13 = vpop.permute.xlu1 %716  ;;  %v1015_v35 = vsel %vm1009_vm5, %v982_v33, %v715_v10 }
  0xaf   : > { %927 = vrot.lane.b32.xlu0 %v657_v47, %s2248_s8  ;;  %v1017_v48 = vsel %vm1009_vm5, %v984_v44, %v717_v13  ;;  %v2594_v13 = vld [vmem:[%s2293_s19 + $0xa8] sm:$0xff]  }
  0xb0   : > { %612 = vrot.lane.b32.xlu1 %v531_v39, %s2244_s23  ;;  %v559_v39 = vshll.u32 %v2549_v29, 16  ;;  %v569_v22 = vshrl.u32 %v2594_v13, 16 }
  0xb1   : > { %v762_v15 = vpop.permute.xlu0 %761 }
  0xb2   : > { %v764_v19 = vpop.permute.xlu1 %763  ;;  %v1048_v0 = vsel %vm1042_vm6, %v1015_v35, %v762_v15  ;;  %v561_v30 = vrot.slane %v559_v39, 1  ;;  %v666_v15 = vsel %vm624_vm0, %v664_v8, %v665_v9  ;;  %v667_v35 = vrot.slane %v2594_v13, 1 }
  0xb3   : > { %929 = vrot.lane.b32.xlu0 %v660_v14, %s2248_s8  ;;  %v1050_v54 = vsel %vm1042_vm6, %v1017_v48, %v764_v19  ;;  %v571_v19 = vshll.u32 %v2594_v13, 16  ;;  %v581_v48 = vshrl.u32 %v2607_v32, 16  ;;  %v670_v8 = vrot.slane %v2607_v32, 1 }
  0xb4   : > { %614 = vrot.lane.b32.xlu1 %v543_v6, %s2244_s23 }
  0xb5   : > { %v797_v20 = vpop.permute.xlu0 %796  ;;  %v573_v23 = vrot.slane %v571_v19, 1  ;;  %v2214_v19 = vld [vmem:[%s2293_s19 + $0xc8] ss:$0 sps:$4 sm:$0x11]  }
  0xb6   : > { %v799_v24 = vpop.permute.xlu1 %798  ;;  %v1081_v43 = vsel %vm1075_vm7, %v1048_v0, %v797_v20  ;;  %v2212_v0 = vld [vmem:[%s2293_s19 + $0xbc] ss:$0 sps:$4 sm:$0x11]  }
  0xb7   : > { %693 = vrot.lane.b32.xlu0 %v657_v47, %s2243_s22  ;;  %v557_v47 = vshrl.u32 %v2549_v29, 16  ;;  %v1083_v57 = vsel %vm1075_vm7, %v1050_v54, %v799_v24  ;;  %v576_v24 = vshll.u32 %v2210_v18, 16  ;;  %v574_v28 = vor.u32 %v573_v23, %v569_v22 }
  0xb8   : > { %695 = vrot.lane.b32.xlu1 %v660_v14, %s2243_s22  ;;  %v588_v53 = vshll.u32 %v2212_v0, 16  ;;  %v671_v9 = vrot.slane %v2212_v0, 1 }
  0xb9   : > { %v834_v26 = vpop.permute.xlu0 %833  ;;  %v562_v61 = vor.u32 %v561_v30, %v557_v47 }
  0xba   : > { %v836_v3 = vpop.permute.xlu1 %835  ;;  %v1114_v45 = vsel %vm1108_vm8, %v1081_v43, %v834_v26 }
  0xbb   : > { %730 = vrot.lane.b32.xlu0 %v2496_v31, %s2241_s20  ;;  %v1116_v58 = vsel %vm1108_vm8, %v1083_v57, %v836_v3  ;;  %v578_v3 = vrot.slane %v576_v24, 1 }
  0xbc   : > { %732 = vrot.lane.b32.xlu1 %v2536_v12, %s2241_s20 }
  0xbd   : > { %v881_v36 = vpop.permute.xlu0 %880  ;;  %v579_v39 = vsel %vm399_vm1, %v574_v28, %v578_v3 }
  0xbe   : > { %v883_v40 = vpop.permute.xlu1 %882  ;;  %v1147_v49 = vsel %vm1141_vm9, %v1114_v45, %v881_v36  ;;  %v668_v36 = vrot.slane %v2210_v18, 1 }
  0xbf   : > { %777 = vrot.lane.b32.xlu0 %v543_v6, %s2245_s24  ;;  %v1149_v59 = vsel %vm1141_vm9, %v1116_v58, %v883_v40  ;;  %v567_v6 = vsel %vm399_vm1, %v562_v61, %v566_v63  ;;  %v583_v40 = vshll.u32 %v2607_v32, 16  ;;  %v590_v63 = vrot.slane %v588_v53, 1 }
  0xc0   : > { %779 = vrot.lane.b32.xlu1 %v555_v37, %s2245_s24  ;;  %v669_v47 = vsel %vm624_vm0, %v667_v35, %v668_v36 }
  0xc1   : > { %v916_v52 = vpop.permute.xlu0 %915 }
  0xc2   : > { %v601_v55 = vpop.permute.xlu1 %600  ;;  %v1180_v56 = vsel %vm1174_vm10, %v1147_v49, %v916_v52 }
  0xc3   : > { %812 = vrot.lane.b32.xlu0 %v660_v14, %s2242_s21  ;;  %2103 = vmatprep.mubr.msk.bf16.mxu0 %vm1243_vm11, %v1180_v56  ;;  %v953_v34 = vsel %vm943_vm3, %v2358_v50, %v601_v55 }
  0xc4   : > { %814 = vrot.lane.b32.xlu1 %v663_v46, %s2242_s21 }
  0xc5   : > { %v918_v60 = vpop.permute.xlu0 %917 }
  0xc6   : > { %v603_v2 = vpop.permute.xlu1 %602  ;;  %v1182_v4 = vsel %vm1174_vm10, %v1149_v59, %v918_v60 }
  0xc7   : > { %849 = vrot.lane.b32.xlu0 %v2536_v12, %s2246_s27  ;;  %2104 = vmatmul.mubr.msk.bf16.gmra.mrb[4].mxu0 %vm1243_vm11, %v1182_v4  ;;  %v955_v43 = vsel %vm943_vm3, %v2377_v62, %v603_v2  ;;  %v585_v62 = vrot.slane %v583_v40, 1 }
  0xc8   : > { %851 = vrot.lane.b32.xlu1 %v2549_v29, %s2246_s27 }
  0xc9   : > { %v682_v5 = vpop.permute.xlu0 %681  ;;  %v586_v61 = vor.u32 %v585_v62, %v581_v48 }
  0xca   : > { %v684_v7 = vpop.permute.xlu1 %683  ;;  %v986_v1 = vsel %vm976_vm4, %v953_v34, %v682_v5  ;;  %v2215_v34 = vld [vmem:[%s2293_s19 + $0xcc] sm:$0xff]  }
  0xcb   : > { %896 = vrot.lane.b32.xlu0 %v555_v37, %s2247_s5  ;;  %v988_v45 = vsel %vm976_vm4, %v955_v43, %v684_v7 }
  0xcc   : > { %898 = vrot.lane.b32.xlu1 %v567_v6, %s2247_s5 }
  0xcd   : > { %v719_v10 = vpop.permute.xlu0 %718 }
  0xce   : > { %v721_v14 = vpop.permute.xlu1 %720 }
  0xcf   : > { %931 = vrot.lane.b32.xlu0 %v663_v46, %s2248_s8  ;;  %v1021_v49 = vsel %vm1009_vm5, %v988_v45, %v721_v14  ;;  %v2652_v14 = vld [vmem:[%s2293_s19 + $0xc0] sm:$0xff]  }
  0xd0   : > { %616 = vrot.lane.b32.xlu1 %v555_v37, %s2244_s23  ;;  %v1019_v37 = vsel %vm1009_vm5, %v986_v1, %v719_v10  ;;  %v746_v23 = vshrl.u32 %v2652_v14, 16 }
  0xd1   : > { %v766_v17 = vpop.permute.xlu0 %765 }
  0xd2   : > { %v768_v20 = vpop.permute.xlu1 %767  ;;  %v1052_v50 = vsel %vm1042_vm6, %v1019_v37, %v766_v17  ;;  %v672_v17 = vsel %vm624_vm0, %v670_v8, %v671_v9  ;;  %v789_v37 = vrot.slane %v2652_v14, 1 }
  0xd3   : > { %933 = vrot.lane.b32.xlu0 %v666_v15, %s2248_s8  ;;  %v1054_v54 = vsel %vm1042_vm6, %v1021_v49, %v768_v20  ;;  %v748_v20 = vshll.u32 %v2652_v14, 16  ;;  %v865_v49 = vshrl.u32 %v2215_v34, 16 }
  0xd4   : > { %618 = vrot.lane.b32.xlu1 %v567_v6, %s2244_s23 }
  0xd5   : > { %v801_v21 = vpop.permute.xlu0 %800  ;;  %v750_v24 = vrot.slane %v748_v20, 1 }
  0xd6   : > { %v803_v26 = vpop.permute.xlu1 %802  ;;  %v1085_v44 = vsel %vm1075_vm7, %v1052_v50, %v801_v21  ;;  %v2216_v50 = vld [vmem:[%s2293_s19 + $0xd4] ss:$0 sps:$4 sm:$0x11]   ;;  %s1848_s19 = sshll.u32 %s2830_s12, 3 }
  0xd7   : > { %697 = vrot.lane.b32.xlu0 %v663_v46, %s2243_s22  ;;  %v1087_v57 = vsel %vm1075_vm7, %v1054_v54, %v803_v26  ;;  %v753_v26 = vshll.u32 %v2214_v19, 16  ;;  %v751_v3 = vor.u32 %v750_v24, %v746_v23  ;;  %v909_v8 = vrot.slane %v2216_v50, 1 }
  0xd8   : > { %699 = vrot.lane.b32.xlu1 %v666_v15, %s2243_s22 }
  0xd9   : > { %v838_v27 = vpop.permute.xlu0 %837 }
  0xda   : > { %v840_v33 = vpop.permute.xlu1 %839  ;;  %v1118_v46 = vsel %vm1108_vm8, %v1085_v44, %v838_v27 }
  0xdb   : > { %734 = vrot.lane.b32.xlu0 %v2549_v29, %s2241_s20  ;;  %v1120_v58 = vsel %vm1108_vm8, %v1087_v57, %v840_v33  ;;  %v755_v33 = vrot.slane %v753_v26, 1 }
  0xdc   : > { %736 = vrot.lane.b32.xlu1 %v2594_v13, %s2241_s20 }
  0xdd   : > { %v885_v38 = vpop.permute.xlu0 %884  ;;  %v756_v40 = vsel %vm399_vm1, %v751_v3, %v755_v33 }
  0xde   : > { %v887_v42 = vpop.permute.xlu1 %886  ;;  %v1151_v52 = vsel %vm1141_vm9, %v1118_v46, %v885_v38  ;;  %v790_v38 = vrot.slane %v2214_v19, 1 }
  0xdf   : > { %781 = vrot.lane.b32.xlu0 %v567_v6, %s2245_s24  ;;  %v1153_v59 = vsel %vm1141_vm9, %v1120_v58, %v887_v42  ;;  %v591_v6 = vsel %vm399_vm1, %v586_v61, %v590_v63  ;;  %v867_v42 = vshll.u32 %v2215_v34, 16 }
  0xe0   : > { %783 = vrot.lane.b32.xlu1 %v579_v39, %s2245_s24  ;;  %v791_v48 = vsel %vm624_vm0, %v789_v37, %v790_v38 }
  0xe1   : > { %v920_v30 = vpop.permute.xlu0 %919  ;;  %v869_v53 = vrot.slane %v867_v42, 1 }
  0xe2   : > { %v605_v55 = vpop.permute.xlu1 %604  ;;  %v1184_v56 = vsel %vm1174_vm10, %v1151_v52, %v920_v30 }
  0xe3   : > { %816 = vrot.lane.b32.xlu0 %v666_v15, %s2242_s21  ;;  %2107 = vmatprep.mubr.msk.bf16.mxu0 %vm1243_vm11, %v1184_v56  ;;  %v957_v35 = vsel %vm943_vm3, %v2402_v16, %v605_v55  ;;  %v870_v61 = vor.u32 %v869_v53, %v865_v49 }
  0xe4   : > { %818 = vrot.lane.b32.xlu1 %v669_v47, %s2242_s21 }
  0xe5   : > { %v922_v60 = vpop.permute.xlu0 %921 }
  0xe6   : > { %v607_v2 = vpop.permute.xlu1 %606  ;;  %v1186_v4 = vsel %vm1174_vm10, %v1153_v59, %v922_v60 }
  0xe7   : > { %853 = vrot.lane.b32.xlu0 %v2594_v13, %s2246_s27  ;;  %2108 = vmatmul.mubr.msk.bf16.gmra.mrb[8].mxu0 %vm1243_vm11, %v1186_v4  ;;  %v959_v44 = vsel %vm943_vm3, %v2415_v25, %v607_v2  ;;  %v872_v25 = vshll.u32 %v2216_v50, 16 }
  0xe8   : > { %855 = vrot.lane.b32.xlu1 %v2607_v32, %s2246_s27 }
  0xe9   : > { %v686_v5 = vpop.permute.xlu0 %685  ;;  %v874_v63 = vrot.slane %v872_v25, 1 }
  0xea   : > { %v688_v7 = vpop.permute.xlu1 %687  ;;  %v990_v36 = vsel %vm976_vm4, %v957_v35, %v686_v5 }
  0xeb   : > { %900 = vrot.lane.b32.xlu0 %v579_v39, %s2247_s5  ;;  %v992_v46 = vsel %vm976_vm4, %v959_v44, %v688_v7  ;;  %v908_v7 = vrot.slane %v2215_v34, 1 }
  0xec   : > { %902 = vrot.lane.b32.xlu1 %v591_v6, %s2247_s5 }
  0xed   : > { %v723_v10 = vpop.permute.xlu0 %722 }
  0xee   : > { %v725_v15 = vpop.permute.xlu1 %724 }
  0xef   : > { %935 = vrot.lane.b32.xlu0 %v669_v47, %s2248_s8  ;;  %v1025_v52 = vsel %vm1009_vm5, %v992_v46, %v725_v15  ;;  %v910_v15 = vsel %vm624_vm0, %v908_v7, %v909_v8 }
  0xf0   : > { %620 = vrot.lane.b32.xlu1 %v579_v39, %s2244_s23  ;;  %v1023_v39 = vsel %vm1009_vm5, %v990_v36, %v723_v10 }
  0xf1   : > { %v770_v18 = vpop.permute.xlu0 %769 }
  0xf2   : > { %v772_v21 = vpop.permute.xlu1 %771  ;;  %v1056_v16 = vsel %vm1042_vm6, %v1023_v39, %v770_v18 }
  0xf3   : > { %937 = vrot.lane.b32.xlu0 %v672_v17, %s2248_s8  ;;  %v1058_v54 = vsel %vm1042_vm6, %v1025_v52, %v772_v21 }
  0xf4   : > { %622 = vrot.lane.b32.xlu1 %v591_v6, %s2244_s23 }
  0xf5   : > { %v805_v22 = vpop.permute.xlu0 %804 }
  0xf6   : > { %v807_v27 = vpop.permute.xlu1 %806  ;;  %v1089_v45 = vsel %vm1075_vm7, %v1056_v16, %v805_v22 }
  0xf7   : > { %701 = vrot.lane.b32.xlu0 %v669_v47, %s2243_s22  ;;  %v1091_v57 = vsel %vm1075_vm7, %v1058_v54, %v807_v27 }
  0xf8   : > { %703 = vrot.lane.b32.xlu1 %v672_v17, %s2243_s22  ;;  %s211_s22 = scalar_lea.vmem %s2824_s3, %s1848_s19 }
  0xf9   : > { %v842_v28 = vpop.permute.xlu0 %841 }
  0xfa   : > { %v844_v1 = vpop.permute.xlu1 %843  ;;  %v1122_v47 = vsel %vm1108_vm8, %v1089_v45, %v842_v28 }
  0xfb   : > { %738 = vrot.lane.b32.xlu0 %v2607_v32, %s2241_s20  ;;  %v1124_v58 = vsel %vm1108_vm8, %v1091_v57, %v844_v1 }
  0xfc   : > { %740 = vrot.lane.b32.xlu1 %v2652_v14, %s2241_s20 }
  0xfd   : > { %v889_v0 = vpop.permute.xlu0 %888 }
  0xfe   : > { %v891_v43 = vpop.permute.xlu1 %890  ;;  %v1155_v30 = vsel %vm1141_vm9, %v1122_v47, %v889_v0 }
  0xff   : > { %785 = vrot.lane.b32.xlu0 %v591_v6, %s2245_s24  ;;  %v1157_v59 = vsel %vm1141_vm9, %v1124_v58, %v891_v43  ;;  %v875_v6 = vsel %vm399_vm1, %v870_v61, %v874_v63 }
 0x100   : > { %787 = vrot.lane.b32.xlu1 %v756_v40, %s2245_s24 }
 0x101   : > { %v924_v62 = vpop.permute.xlu0 %923 }
 0x102   : > { %v609_v55 = vpop.permute.xlu1 %608  ;;  %v1188_v56 = vsel %vm1174_vm10, %v1155_v30, %v924_v62 }
 0x103   : > { %820 = vrot.lane.b32.xlu0 %v672_v17, %s2242_s21  ;;  %2111 = vmatprep.mubr.msk.bf16.mxu0 %vm1243_vm11, %v1188_v56  ;;  %v961_v23 = vsel %vm943_vm3, %v2440_v41, %v609_v55 }
 0x104   : > { %822 = vrot.lane.b32.xlu1 %v791_v48, %s2242_s21 }
 0x105   : > { %v926_v60 = vpop.permute.xlu0 %925 }
 0x106   : > { %v611_v2 = vpop.permute.xlu1 %610  ;;  %v1190_v4 = vsel %vm1174_vm10, %v1157_v59, %v926_v60 }
 0x107   : > { %857 = vrot.lane.b32.xlu0 %v2652_v14, %s2246_s27  ;;  %2112 = vmatmul.mubr.msk.bf16.gmra.mrb[12].mxu0 %vm1243_vm11, %v1190_v4  ;;  %v963_v33 = vsel %vm943_vm3, %v2453_v51, %v611_v2 }
 0x108   : > { %859 = vrot.lane.b32.xlu1 %v2215_v34, %s2246_s27 }
 0x109   : > { %v690_v5 = vpop.permute.xlu0 %689 }
 0x10a   : > { %v692_v9 = vpop.permute.xlu1 %691  ;;  %v994_v24 = vsel %vm976_vm4, %v961_v23, %v690_v5 }
 0x10b   : > { %904 = vrot.lane.b32.xlu0 %v756_v40, %s2247_s5  ;;  %v996_v1 = vsel %vm976_vm4, %v963_v33, %v692_v9 }
 0x10c   : > { %906 = vrot.lane.b32.xlu1 %v875_v6, %s2247_s5 }
 0x10d   : > { %v727_v10 = vpop.permute.xlu0 %726 }
 0x10e   : > { %v729_v17 = vpop.permute.xlu1 %728  ;;  %v1027_v26 = vsel %vm1009_vm5, %v994_v24, %v727_v10 }
 0x10f   : > { %939 = vrot.lane.b32.xlu0 %v791_v48, %s2248_s8  ;;  %v1029_v36 = vsel %vm1009_vm5, %v996_v1, %v729_v17 }
 0x110   : > { %941 = vrot.lane.b32.xlu1 %v910_v15, %s2248_s8 }
 0x111   : > { %v774_v14 = vpop.permute.xlu0 %773 }
 0x112   : > { %v776_v18 = vpop.permute.xlu1 %775  ;;  %v1060_v28 = vsel %vm1042_vm6, %v1027_v26, %v774_v14 }
 0x113   : > { %v1062_v38 = vsel %vm1042_vm6, %v1029_v36, %v776_v18 }
 0x115   : > { %v809_v19 = vpop.permute.xlu0 %808 }
 0x116   : > { %v811_v20 = vpop.permute.xlu1 %810  ;;  %v1093_v34 = vsel %vm1075_vm7, %v1060_v28, %v809_v19 }
 0x117   : > { %v1095_v40 = vsel %vm1075_vm7, %v1062_v38, %v811_v20 }
 0x119   : > { %v846_v21 = vpop.permute.xlu0 %845 }
 0x11a   : > { %v848_v22 = vpop.permute.xlu1 %847  ;;  %v1126_v35 = vsel %vm1108_vm8, %v1093_v34, %v846_v21 }
 0x11b   : > { %v1128_v51 = vsel %vm1108_vm8, %v1095_v40, %v848_v22 }
 0x11d   : > { %v893_v27 = vpop.permute.xlu0 %892 }
 0x11e   : > { %v895_v3 = vpop.permute.xlu1 %894  ;;  %v1159_v41 = vsel %vm1141_vm9, %v1126_v35, %v893_v27 }
 0x11f   : > { %v1161_v50 = vsel %vm1141_vm9, %v1128_v51, %v895_v3 }
 0x121   : > { %v928_v37 = vpop.permute.xlu0 %927 }
 0x122   : > { %v613_v39 = vpop.permute.xlu1 %612  ;;  %v1192_v0 = vsel %vm1174_vm10, %v1159_v41, %v928_v37 }
 0x123   : > { %2115 = vmatprep.mubr.msk.bf16.mxu1 %vm1243_vm11, %v1192_v0  ;;  %v965_v25 = vsel %vm943_vm3, %v2478_v11, %v613_v39 }
 0x125   : > { %v930_v42 = vpop.permute.xlu0 %929 }
 0x126   : > { %v615_v16 = vpop.permute.xlu1 %614  ;;  %v1194_v43 = vsel %vm1174_vm10, %v1161_v50, %v930_v42 }
 0x127   : > { %2116 = vmatmul.mubr.msk.bf16.vlgmr.msra.gmra.mrb[0].mxu1 %vm1243_vm11, %v1194_v43  ;;  %v967_v59 = vsel %vm943_vm3, %v2496_v31, %v615_v16 }
 0x129   : > { %v694_v44 = vpop.permute.xlu0 %693 }
 0x12a   : > { %v696_v45 = vpop.permute.xlu1 %695  ;;  %v998_v54 = vsel %vm976_vm4, %v965_v25, %v694_v44 }
 0x12b   : > { %v1000_v61 = vsel %vm976_vm4, %v967_v59, %v696_v45 }
 0x12d   : > { %v731_v46 = vpop.permute.xlu0 %730 }
 0x12e   : > { %v733_v47 = vpop.permute.xlu1 %732  ;;  %v1031_v55 = vsel %vm1009_vm5, %v998_v54, %v731_v46 }
 0x12f   : > { %v1033_v2 = vsel %vm1009_vm5, %v1000_v61, %v733_v47 }
 0x131   : > { %v778_v48 = vpop.permute.xlu0 %777 }
 0x132   : > { %v780_v49 = vpop.permute.xlu1 %779  ;;  %v1064_v57 = vsel %vm1042_vm6, %v1031_v55, %v778_v48 }
 0x133   : > { %v1066_v5 = vsel %vm1042_vm6, %v1033_v2, %v780_v49 }
 0x135   : > { %v813_v52 = vpop.permute.xlu0 %812 }
 0x136   : > { %v815_v30 = vpop.permute.xlu1 %814  ;;  %v1097_v60 = vsel %vm1075_vm7, %v1064_v57, %v813_v52 }
 0x137   : > { %v1099_v8 = vsel %vm1075_vm7, %v1066_v5, %v815_v30 }
 0x139   : > { %v850_v62 = vpop.permute.xlu0 %849 }
 0x13a   : > { %v852_v53 = vpop.permute.xlu1 %851  ;;  %v1130_v63 = vsel %vm1108_vm8, %v1097_v60, %v850_v62 }
 0x13b   : > { %v1132_v31 = vsel %vm1108_vm8, %v1099_v8, %v852_v53 }
 0x13d   : > { %v897_v56 = vpop.permute.xlu0 %896 }
 0x13e   : > { %v899_v58 = vpop.permute.xlu1 %898  ;;  %v1163_v11 = vsel %vm1141_vm9, %v1130_v63, %v897_v56 }
 0x13f   : > { %v1165_v9 = vsel %vm1141_vm9, %v1132_v31, %v899_v58 }
 0x141   : > { %v932_v4 = vpop.permute.xlu0 %931 }
 0x142   : > { %v617_v6 = vpop.permute.xlu1 %616  ;;  %v1196_v7 = vsel %vm1174_vm10, %v1163_v11, %v932_v4 }
 0x143   : > { %2119 = vmatprep.mubr.msk.bf16.mxu1 %vm1243_vm11, %v1196_v7  ;;  %v969_v28 = vsel %vm943_vm3, %v2536_v12, %v617_v6 }
 0x145   : > { %v934_v10 = vpop.permute.xlu0 %933 }
 0x146   : > { %v619_v15 = vpop.permute.xlu1 %618  ;;  %v1198_v17 = vsel %vm1174_vm10, %v1165_v9, %v934_v10 }
 0x147   : > { %2120 = vmatmul.mubr.msk.bf16.gmra.mrb[4].mxu1 %vm1243_vm11, %v1198_v17  ;;  %v971_v36 = vsel %vm943_vm3, %v2549_v29, %v619_v15 }
 0x149   : > { %v698_v14 = vpop.permute.xlu0 %697 }
 0x14a   : > { %v700_v18 = vpop.permute.xlu1 %699  ;;  %v1002_v3 = vsel %vm976_vm4, %v969_v28, %v698_v14 }
 0x14b   : > { %v1004_v37 = vsel %vm976_vm4, %v971_v36, %v700_v18 }
 0x14d   : > { %v735_v19 = vpop.permute.xlu0 %734 }
 0x14e   : > { %v737_v20 = vpop.permute.xlu1 %736  ;;  %v1035_v33 = vsel %vm1009_vm5, %v1002_v3, %v735_v19 }
 0x14f   : > { %v1037_v39 = vsel %vm1009_vm5, %v1004_v37, %v737_v20 }
 0x151   : > { %v782_v21 = vpop.permute.xlu0 %781 }
 0x152   : > { %v784_v22 = vpop.permute.xlu1 %783  ;;  %v1068_v1 = vsel %vm1042_vm6, %v1035_v33, %v782_v21 }
 0x153   : > { %v1070_v40 = vsel %vm1042_vm6, %v1037_v39, %v784_v22 }
 0x155   : > { %v817_v23 = vpop.permute.xlu0 %816 }
 0x156   : > { %v819_v24 = vpop.permute.xlu1 %818  ;;  %v1101_v41 = vsel %vm1075_vm7, %v1068_v1, %v817_v23 }
 0x157   : > { %v1103_v42 = vsel %vm1075_vm7, %v1070_v40, %v819_v24 }
 0x159   : > { %v854_v26 = vpop.permute.xlu0 %853 }
 0x15a   : > { %v856_v27 = vpop.permute.xlu1 %855  ;;  %v1134_v38 = vsel %vm1108_vm8, %v1101_v41, %v854_v26 }
 0x15b   : > { %v1136_v29 = vsel %vm1108_vm8, %v1103_v42, %v856_v27 }
 0x15d   : > { %v901_v34 = vpop.permute.xlu0 %900 }
 0x15e   : > { %v903_v35 = vpop.permute.xlu1 %902  ;;  %v1167_v12 = vsel %vm1141_vm9, %v1134_v38, %v901_v34 }
 0x15f   : > { %v1169_v16 = vsel %vm1141_vm9, %v1136_v29, %v903_v35 }
 0x161   : > { %v936_v0 = vpop.permute.xlu0 %935 }
 0x162   : > { %v621_v51 = vpop.permute.xlu1 %620  ;;  %v1200_v50 = vsel %vm1174_vm10, %v1167_v12, %v936_v0 }
 0x163   : > { %2123 = vmatprep.mubr.msk.bf16.mxu1 %vm1243_vm11, %v1200_v50  ;;  %v973_v54 = vsel %vm943_vm3, %v2594_v13, %v621_v51 }
 0x165   : > { %v938_v43 = vpop.permute.xlu0 %937 }
 0x166   : > { %v623_v44 = vpop.permute.xlu1 %622  ;;  %v1202_v45 = vsel %vm1174_vm10, %v1169_v16, %v938_v43 }
 0x167   : > { %2124 = vmatmul.mubr.msk.bf16.gmra.mrb[8].mxu1 %vm1243_vm11, %v1202_v45  ;;  %v975_v55 = vsel %vm943_vm3, %v2607_v32, %v623_v44 }
 0x169   : > { %v702_v46 = vpop.permute.xlu0 %701 }
 0x16a   : > { %v704_v47 = vpop.permute.xlu1 %703  ;;  %v1006_v59 = vsel %vm976_vm4, %v973_v54, %v702_v46 }
 0x16b   : > { %v1008_v58 = vsel %vm976_vm4, %v975_v55, %v704_v47 }
 0x16d   : > { %v739_v48 = vpop.permute.xlu0 %738 }
 0x16e   : > { %v741_v49 = vpop.permute.xlu1 %740  ;;  %v1039_v63 = vsel %vm1009_vm5, %v1006_v59, %v739_v48 }
 0x16f   : > { %v1041_v61 = vsel %vm1009_vm5, %v1008_v58, %v741_v49 }
 0x171   : > { %v786_v52 = vpop.permute.xlu0 %785 }
 0x172   : > { %v788_v30 = vpop.permute.xlu1 %787  ;;  %v1072_v2 = vsel %vm1042_vm6, %v1039_v63, %v786_v52 }
 0x173   : > { %v1074_v32 = vsel %vm1042_vm6, %v1041_v61, %v788_v30 }
 0x175   : > { %v821_v62 = vpop.permute.xlu0 %820 }
 0x176   : > { %v823_v53 = vpop.permute.xlu1 %822  ;;  %v1105_v15 = vsel %vm1075_vm7, %v1072_v2, %v821_v62 }
 0x177   : > { %v1107_v10 = vsel %vm1075_vm7, %v1074_v32, %v823_v53 }
 0x179   : > { %v858_v25 = vpop.permute.xlu0 %857 }
 0x17a   : > { %v860_v56 = vpop.permute.xlu1 %859  ;;  %v2101_v57 = vpop.f32.mrb[0].mxu0  ;;  %v1138_v17 = vsel %vm1108_vm8, %v1105_v15, %v858_v25 }
 0x17b   : > { %v1314_v60 = vpop.f32.mrb[1].mxu0  ;;  %v1640_v14 = vmul.f32 %v2101_v57, %v2101_v57  ;;  %v1140_v20 = vsel %vm1108_vm8, %v1107_v10, %v860_v56 }
 0x17c   : > { %v2102_v13 = vpop.f32.mrb[2].mxu0  ;;  %v1638_v6 = vmul.f32 %v1314_v60, %v1314_v60 }
 0x17d   : > { %v1981_v11 = vpack.c.bf16 %v2102_v13, %v2101_v57  ;;  %v1317_v4 = vpop.f32.mrb[3].mxu0  ;;  %v905_v5 = vpop.permute.xlu0 %904  ;;  %v1641_v21 = vmul.f32 %v2102_v13, %v2102_v13 }
 0x17e   : > { %v907_v7 = vpop.permute.xlu1 %906  ;;  %v1976_v8 = vpack.c.bf16 %v1317_v4, %v1314_v60  ;;  %v1601_v31 = vadd.f32 %v1317_v4, %v1314_v60  ;;  %v1639_v9 = vmul.f32 %v1317_v4, %v1317_v4  ;;  %v1171_v22 = vsel %vm1141_vm9, %v1138_v17, %v905_v5 }
 0x17f   : > { %2053 = vst [vmem:[%s2778_s18 + $0x8] sm:$0xff] %v1981_v11   ;;  %v1173_v24 = vsel %vm1141_vm9, %v1140_v20, %v907_v7 }
 0x180   : > { %1977 = vst [vmem:[%s2778_s18] sm:$0xff] %v1976_v8   ;;  %v1602_v18 = vadd.f32 %v2101_v57, %v1601_v31  ;;  %v1670_v19 = vadd.f32 %v1639_v9, %v1638_v6 }
 0x181   : > { %v940_v23 = vpop.permute.xlu0 %939 }
 0x182   : > { %v1671_v26 = vadd.f32 %v1670_v19, %v1640_v14  ;;  %v942_v27 = vpop.permute.xlu1 %941  ;;  %v1204_v28 = vsel %vm1174_vm10, %v1171_v22, %v940_v23  ;;  %v1603_v3 = vadd.f32 %v2102_v13, %v1602_v18 }
 0x183   : > { %v1206_v33 = vsel %vm1174_vm10, %v1173_v24, %v942_v27  ;;  %2127 = vmatprep.mubr.msk.bf16.mxu1 %vm1243_vm11, %v1204_v28 }
 0x184   : > { %2128 = vmatmul.mubr.msk.bf16.gmra.mrb[12].mxu1 %vm1243_vm11, %v1206_v33  ;;  %v1672_v34 = vadd.f32 %v1671_v26, %v1641_v21 }
 0x19a   : > { %v2105_v1 = vpop.f32.mrb[4].mxu0 }
 0x19b   : > { %v1330_v35 = vpop.f32.mrb[5].mxu0  ;;  %v1644_v50 = vmul.f32 %v2105_v1, %v2105_v1 }
 0x19c   : > { %v1604_v36 = vadd.f32 %v1603_v3, %v1330_v35  ;;  %v1642_v41 = vmul.f32 %v1330_v35, %v1330_v35  ;;  %v2106_v37 = vpop.f32.mrb[6].mxu0 }
 0x19d   : > { %v1991_v38 = vpack.c.bf16 %v2106_v37, %v2105_v1  ;;  %v1333_v39 = vpop.f32.mrb[7].mxu0  ;;  %v1645_v16 = vmul.f32 %v2106_v37, %v2106_v37 }
 0x19e   : > { %v1673_v12 = vadd.f32 %v1672_v34, %v1642_v41  ;;  %v1986_v0 = vpack.c.bf16 %v1333_v39, %v1330_v35  ;;  %v1605_v40 = vadd.f32 %v1604_v36, %v1333_v39  ;;  %v1643_v51 = vmul.f32 %v1333_v39, %v1333_v39 }
 0x19f   : > { %2055 = vst [vmem:[%s2778_s18 + $0x18] sm:$0xff] %v1991_v38  }
 0x1a0   : > { %2054 = vst [vmem:[%s2778_s18 + $0x10] sm:$0xff] %v1986_v0   ;;  %v1606_v42 = vadd.f32 %v2105_v1, %v1605_v40  ;;  %v1674_v29 = vadd.f32 %v1673_v12, %v1643_v51 }
 0x1a2   : > { %v1675_v43 = vadd.f32 %v1674_v29, %v1644_v50  ;;  %v1607_v44 = vadd.f32 %v2106_v37, %v1606_v42 }
 0x1a4   : > { %v1676_v45 = vadd.f32 %v1675_v43, %v1645_v16 }
 0x1ba   : > { %v2109_v46 = vpop.f32.mrb[8].mxu0 }
 0x1bb   : > { %v1346_v47 = vpop.f32.mrb[9].mxu0  ;;  %v1648_v56 = vmul.f32 %v2109_v46, %v2109_v46 }
 0x1bc   : > { %v1608_v48 = vadd.f32 %v1607_v44, %v1346_v47  ;;  %v1646_v49 = vmul.f32 %v1346_v47, %v1346_v47  ;;  %v2110_v52 = vpop.f32.mrb[10].mxu0 }
 0x1bd   : > { %v2001_v30 = vpack.c.bf16 %v2110_v52, %v2109_v46  ;;  %v1349_v62 = vpop.f32.mrb[11].mxu0  ;;  %v1649_v59 = vmul.f32 %v2110_v52, %v2110_v52 }
 0x1be   : > { %v1677_v53 = vadd.f32 %v1676_v45, %v1646_v49  ;;  %v1996_v25 = vpack.c.bf16 %v1349_v62, %v1346_v47  ;;  %v1609_v54 = vadd.f32 %v1608_v48, %v1349_v62  ;;  %v1647_v55 = vmul.f32 %v1349_v62, %v1349_v62 }
 0x1bf   : > { %2057 = vst [vmem:[%s2778_s18 + $0x28] sm:$0xff] %v2001_v30  }
 0x1c0   : > { %2056 = vst [vmem:[%s2778_s18 + $0x20] sm:$0xff] %v1996_v25   ;;  %v1610_v57 = vadd.f32 %v2109_v46, %v1609_v54  ;;  %v1678_v58 = vadd.f32 %v1677_v53, %v1647_v55 }
 0x1c2   : > { %v1679_v60 = vadd.f32 %v1678_v58, %v1648_v56  ;;  %v1611_v61 = vadd.f32 %v2110_v52, %v1610_v57 }
 0x1c4   : > { %v1680_v63 = vadd.f32 %v1679_v60, %v1649_v59 }
 0x1da   : > { %v2113_v13 = vpop.f32.mrb[12].mxu0 }
 0x1db   : > { %v1362_v32 = vpop.f32.mrb[13].mxu0  ;;  %v1652_v10 = vmul.f32 %v2113_v13, %v2113_v13 }
 0x1dc   : > { %v1612_v2 = vadd.f32 %v1611_v61, %v1362_v32  ;;  %v1650_v11 = vmul.f32 %v1362_v32, %v1362_v32  ;;  %v2114_v4 = vpop.f32.mrb[14].mxu0 }
 0x1dd   : > { %v2011_v5 = vpack.c.bf16 %v2114_v4, %v2113_v13  ;;  %v1365_v6 = vpop.f32.mrb[15].mxu0  ;;  %v1653_v14 = vmul.f32 %v2114_v4, %v2114_v4 }
 0x1de   : > { %v1681_v7 = vadd.f32 %v1680_v63, %v1650_v11  ;;  %v2006_v8 = vpack.c.bf16 %v1365_v6, %v1362_v32  ;;  %v1613_v31 = vadd.f32 %v1612_v2, %v1365_v6  ;;  %v1651_v9 = vmul.f32 %v1365_v6, %v1365_v6 }
 0x1df   : > { %2059 = vst [vmem:[%s2778_s18 + $0x38] sm:$0xff] %v2011_v5  }
 0x1e0   : > { %2058 = vst [vmem:[%s2778_s18 + $0x30] sm:$0xff] %v2006_v8   ;;  %v1614_v15 = vadd.f32 %v2113_v13, %v1613_v31  ;;  %v1682_v17 = vadd.f32 %v1681_v7, %v1651_v9 }
 0x1e2   : > { %v1683_v18 = vadd.f32 %v1682_v17, %v1652_v10  ;;  %v1615_v19 = vadd.f32 %v2114_v4, %v1614_v15 }
 0x1e4   : > { %v1684_v20 = vadd.f32 %v1683_v18, %v1653_v14 }
 0x1fa   : > { %v2117_v21 = vpop.f32.mrb[0].mxu1 }
 0x1fb   : > { %v1378_v22 = vpop.f32.mrb[1].mxu1  ;;  %v1656_v35 = vmul.f32 %v2117_v21, %v2117_v21 }
 0x1fc   : > { %v1616_v23 = vadd.f32 %v1615_v19, %v1378_v22  ;;  %v1654_v24 = vmul.f32 %v1378_v22, %v1378_v22  ;;  %v2118_v26 = vpop.f32.mrb[2].mxu1 }
 0x1fd   : > { %v2021_v27 = vpack.c.bf16 %v2118_v26, %v2117_v21  ;;  %v1381_v28 = vpop.f32.mrb[3].mxu1  ;;  %v1657_v37 = vmul.f32 %v2118_v26, %v2118_v26 }
 0x1fe   : > { %v1685_v3 = vadd.f32 %v1684_v20, %v1654_v24  ;;  %v2016_v33 = vpack.c.bf16 %v1381_v28, %v1378_v22  ;;  %v1617_v34 = vadd.f32 %v1616_v23, %v1381_v28  ;;  %v1655_v1 = vmul.f32 %v1381_v28, %v1381_v28 }
 0x1ff   : > { %2061 = vst [vmem:[%s2778_s18 + $0x48] sm:$0xff] %v2021_v27  }
 0x200   : > { %2060 = vst [vmem:[%s2778_s18 + $0x40] sm:$0xff] %v2016_v33   ;;  %v1618_v36 = vadd.f32 %v2117_v21, %v1617_v34  ;;  %v1686_v41 = vadd.f32 %v1685_v3, %v1655_v1 }
 0x202   : > { %v1687_v38 = vadd.f32 %v1686_v41, %v1656_v35  ;;  %v1619_v39 = vadd.f32 %v2118_v26, %v1618_v36  ;;  %v1707_v35 = vlaneseq }
 0x204   : > { %v1688_v12 = vadd.f32 %v1687_v38, %v1657_v37 }
 0x21a   : > { %v2121_v0 = vpop.f32.mrb[4].mxu1 }
 0x21b   : > { %v1394_v40 = vpop.f32.mrb[5].mxu1  ;;  %v1660_v47 = vmul.f32 %v2121_v0, %v2121_v0 }
 0x21c   : > { %v1620_v51 = vadd.f32 %v1619_v39, %v1394_v40  ;;  %v1658_v50 = vmul.f32 %v1394_v40, %v1394_v40  ;;  %v2122_v42 = vpop.f32.mrb[6].mxu1  ;;  %v1708_v39 = vshrl.u32 %v1707_v35, 7 }
 0x21d   : > { %v2031_v29 = vpack.c.bf16 %v2122_v42, %v2121_v0  ;;  %v1397_v16 = vpop.f32.mrb[7].mxu1  ;;  %v1661_v52 = vmul.f32 %v2122_v42, %v2122_v42 }
 0x21e   : > { %v1689_v43 = vadd.f32 %v1688_v12, %v1658_v50  ;;  %v2026_v44 = vpack.c.bf16 %v1397_v16, %v1394_v40  ;;  %v1621_v45 = vadd.f32 %v1620_v51, %v1397_v16  ;;  %v1659_v46 = vmul.f32 %v1397_v16, %v1397_v16 }
 0x21f   : > { %2063 = vst [vmem:[%s2778_s18 + $0x58] sm:$0xff] %v2031_v29   ;;  %vm1710_vm12 = vcmp.eq.s32.totalorder %v1708_v39, 1  ;;  %vm1709_vm13 = vcmp.eq.s32.totalorder %v1708_v39, 0 }
 0x220   : > { %2062 = vst [vmem:[%s2778_s18 + $0x50] sm:$0xff] %v2026_v44   ;;  %v1622_v48 = vadd.f32 %v2121_v0, %v1621_v45  ;;  %v1690_v49 = vadd.f32 %v1689_v43, %v1659_v46 }
 0x222   : > { %v1691_v30 = vadd.f32 %v1690_v49, %v1660_v47  ;;  %v1623_v62 = vadd.f32 %v2122_v42, %v1622_v48 }
 0x224   : > { %v1692_v53 = vadd.f32 %v1691_v30, %v1661_v52 }
 0x23a   : > { %v2125_v25 = vpop.f32.mrb[8].mxu1 }
 0x23b   : > { %v1410_v54 = vpop.f32.mrb[9].mxu1  ;;  %v1664_v32 = vmul.f32 %v2125_v25, %v2125_v25 }
 0x23c   : > { %v1624_v55 = vadd.f32 %v1623_v62, %v1410_v54  ;;  %v1662_v56 = vmul.f32 %v1410_v54, %v1410_v54  ;;  %v2126_v57 = vpop.f32.mrb[10].mxu1 }
 0x23d   : > { %v2041_v58 = vpack.c.bf16 %v2126_v57, %v2125_v25  ;;  %v1413_v59 = vpop.f32.mrb[11].mxu1  ;;  %v1665_v4 = vmul.f32 %v2126_v57, %v2126_v57 }
 0x23e   : > { %v1693_v60 = vadd.f32 %v1692_v53, %v1662_v56  ;;  %v2036_v61 = vpack.c.bf16 %v1413_v59, %v1410_v54  ;;  %v1625_v63 = vadd.f32 %v1624_v55, %v1413_v59  ;;  %v1663_v13 = vmul.f32 %v1413_v59, %v1413_v59 }
 0x23f   : > { %2065 = vst [vmem:[%s2778_s18 + $0x68] sm:$0xff] %v2041_v58  }
 0x240   : > { %2064 = vst [vmem:[%s2778_s18 + $0x60] sm:$0xff] %v2036_v61   ;;  %v1626_v2 = vadd.f32 %v2125_v25, %v1625_v63  ;;  %v1694_v11 = vadd.f32 %v1693_v60, %v1663_v13 }
 0x242   : > { %v1695_v5 = vadd.f32 %v1694_v11, %v1664_v32  ;;  %v1627_v6 = vadd.f32 %v2126_v57, %v1626_v2 }
 0x244   : > { %v1696_v7 = vadd.f32 %v1695_v5, %v1665_v4 }
 0x257   : > { %v2129_v8 = vpop.f32.mrb[12].mxu1 }
 0x258   : > { %v1426_v31 = vpop.f32.mrb[13].mxu1  ;;  %v1668_v22 = vmul.f32 %v2129_v8, %v2129_v8 }
 0x259   : > { %v1628_v9 = vadd.f32 %v1627_v6, %v1426_v31  ;;  %v1666_v10 = vmul.f32 %v1426_v31, %v1426_v31  ;;  %v2130_v15 = vpop.f32.mrb[14].mxu1 }
 0x25a   : > { %v2051_v17 = vpack.c.bf16 %v2130_v15, %v2129_v8  ;;  %v1429_v14 = vpop.f32.mrb[15].mxu1  ;;  %v1669_v26 = vmul.f32 %v2130_v15, %v2130_v15 }
 0x25b   : > { %v1697_v18 = vadd.f32 %v1696_v7, %v1666_v10  ;;  %v2046_v19 = vpack.c.bf16 %v1429_v14, %v1426_v31  ;;  %v1629_v20 = vadd.f32 %v1628_v9, %v1429_v14  ;;  %v1667_v21 = vmul.f32 %v1429_v14, %v1429_v14 }
 0x25c   : > { %2067 = vst [vmem:[%s2778_s18 + $0x78] sm:$0xff] %v2051_v17  }
 0x25d   : > { %2066 = vst [vmem:[%s2778_s18 + $0x70] sm:$0xff] %v2046_v19   ;;  %v1630_v23 = vadd.f32 %v2129_v8, %v1629_v20  ;;  %v1698_v24 = vadd.f32 %v1697_v18, %v1667_v21 }
 0x25f   : > { %v1631_v27 = vadd.f32 %v2130_v15, %v1630_v23  ;;  %v1699_v28 = vadd.f32 %v1698_v24, %v1668_v22 }
 0x261   : > { %v1632_v3 = vrot.slane %v1631_v27, 4  ;;  %v1700_v33 = vadd.f32 %v1699_v28, %v1669_v26 }
 0x263   : > { %v1633_v34 = vadd.f32 %v1632_v3, %v1631_v27  ;;  %v1701_v1 = vrot.slane %v1700_v33, 4 }
 0x265   : > { %v1634_v36 = vrot.slane %v1633_v34, 2  ;;  %v1702_v41 = vadd.f32 %v1701_v1, %v1700_v33 }
 0x267   : > { %v1635_v37 = vadd.f32 %v1634_v36, %v1633_v34  ;;  %v1703_v38 = vrot.slane %v1702_v41, 2 }
 0x269   : > { %v1704_v12 = vadd.f32 %v1703_v38, %v1702_v41  ;;  %v1636_v0 = vrot.slane %v1635_v37, 1 }
 0x26b   : > { %v1705_v40 = vrot.slane %v1704_v12, 1  ;;  %v1637_v50 = vadd.f32 %v1636_v0, %v1635_v37 }
 0x26d   : > { %v1706_v51 = vadd.f32 %v1705_v40, %v1704_v12 }
 0x26f   : > { %v1711_v42 = vsel %vm1710_vm12, %v1706_v51, 0.0 }
 0x270   : > { %v1712_v29 = vsel %vm1709_vm13, %v1637_v50, %v1711_v42 }
 0x271   : > { %1713 = vst [vmem:[%s211_s22] sm:$0xff] %v1712_v29 }
 0x272 PF: > { %s14_s14 = sadd.s32 1, %s2239_s14   ;;  %s2825_s12 = smov %s2235_s13 }
 0x273   : > { %p11_p5 = scmp.ge.s32.totalorder %s14_s14, 4   ;;  %s2826_s13 = smov %s2828_s15 }
 0x275   :  { %13 = sbr.rel (!%p11_p5) target bundleno = 2 (0x2), region = 71 }

</bundles_post_ra>
